<compile_context>
chip_gen: v7x
topology: tpu7x:2x2x1
jax: 0.10.0
libtpu: 0.0.40
codegen_flags: <defaults>
</compile_context>

<pallas_src>
import math
import functools

import jax
import jax.numpy as jnp
from jax.experimental import pallas as pl
from jax.experimental.pallas import tpu as pltpu


def _contact_block_kernel(x_ref, y_ref, ln_ref, wqkv_ref, wo_ref, o_ref,
                          *, heads_num, head_dim, eps, matmul_dtype):
    bb, S, D = x_ref.shape                      # one grid step == `bb` batch elements
    x = x_ref[...]                              # (bb, S, D) f32
    y = y_ref[...]
    lnp = ln_ref[...]                           # (4, D): [gx, bx, gy, by]
    gx, bx = lnp[0:1, :], lnp[1:2, :]
    gy, by = lnp[2:3, :], lnp[3:4, :]

    def layer_norm(v, gamma, beta):
        # One-pass (biased) variance: E[x^2] - mu^2 -> one XLU reduction saved per LN.
        mu = jnp.mean(v, axis=-1, keepdims=True)
        var = jnp.mean(v * v, axis=-1, keepdims=True) - mu * mu
        return (v - mu) * jax.lax.rsqrt(var + eps) * gamma + beta

    z = layer_norm(x, gx, bx) + layer_norm(y, gy, by)         # (bb, S, D) f32

    # Fused QKV projection: one wide MXU matmul, narrow operands, f32 accumulation.
    z2 = z.reshape(bb * S, D).astype(matmul_dtype)
    wqkv = wqkv_ref[...].astype(matmul_dtype)                 # (D, 3D)
    qkv = jnp.dot(z2, wqkv, preferred_element_type=jnp.float32)  # (bb*S, 3D) f32

    # Lane-aligned slices (D is a multiple of 128 in the demo -> tile-boundary slices).
    q = qkv[:, 0:D]
    k = qkv[:, D:2 * D]
    v = qkv[:, 2 * D:3 * D]

    # Fold the 1/sqrt(Dh) scale into q once (instead of scaling each (S,S) score tile).
    q = q * (1.0 / math.sqrt(head_dim))

    # Batched multi-head attention: one dot_general per stage for ALL heads.
    def split_heads(t):
        # (bb*S, D) -> (bb*H, S, Dh)   (leading batch dim -> Mosaic-friendly 3-D dots)
        return (t.reshape(bb, S, heads_num, head_dim)
                 .transpose(0, 2, 1, 3)
                 .reshape(bb * heads_num, S, head_dim))

    qh = split_heads(q).astype(matmul_dtype)
    kh = split_heads(k).astype(matmul_dtype)
    vh = split_heads(v).astype(matmul_dtype)

    s = jnp.einsum("bqd,bkd->bqk", qh, kh,
                   preferred_element_type=jnp.float32)        # (bb*H, S, S) f32
    s = s - jnp.max(s, axis=-1, keepdims=True)
    p = jnp.exp(s)                                            # EUP
    p = p * pl.reciprocal(jnp.sum(p, axis=-1, keepdims=True), approx=True)

    att = jnp.einsum("bqk,bkd->bqd", p.astype(matmul_dtype), vh,
                     preferred_element_type=jnp.float32)      # (bb*H, S, Dh) f32

    # Merge heads back to (bb*S, D) and apply the output projection.
    att = (att.reshape(bb, heads_num, S, head_dim)
              .transpose(0, 2, 1, 3)
              .reshape(bb * S, D)).astype(matmul_dtype)
    out = jnp.dot(att, wo_ref[...].astype(matmul_dtype),
                  preferred_element_type=jnp.float32)         # (bb*S, D) f32

    o_ref[...] = out.reshape(bb, S, D)


def contact_block(x, y, params, *, heads_num,
                  batch_block=None, matmul_dtype=jnp.bfloat16):
    """ContactBlock forward.

    params: ln (4,D) = [gx,bx,gy,by]; wq/wk/wv/wo (D,D) stored (in, out), bias=False.
    """
    B, S, D = x.shape
    assert D % heads_num == 0
    head_dim = D // heads_num

    # Default: collapse the whole (small) batch into one grid step — weights are
    # DMA'd exactly once and there is no per-step pipeline overhead.  For large B
    # (or to shard across v7x's two TensorCores) pass a smaller batch_block so the
    # 'parallel' grid axis has >= 2 steps.
    if batch_block is None:
        batch_block = B
    assert B % batch_block == 0
    num_blocks = B // batch_block

    # Pack Wq|Wk|Wv once (layout plumbing, not compute hoisting): one DMA + one wide dot.
    wqkv = jnp.concatenate([params["wq"], params["wk"], params["wv"]], axis=1)  # (D, 3D)

    kernel = functools.partial(
        _contact_block_kernel,
        heads_num=heads_num, head_dim=head_dim, eps=1e-5, matmul_dtype=matmul_dtype)

    batch_spec = pl.BlockSpec((batch_block, S, D), lambda b: (b, 0, 0))
    ln_spec = pl.BlockSpec((4, D), lambda b: (0, 0))
    qkv_spec = pl.BlockSpec((D, 3 * D), lambda b: (0, 0))
    wo_spec = pl.BlockSpec((D, D), lambda b: (0, 0))

    return pl.pallas_call(
        kernel,
        out_shape=jax.ShapeDtypeStruct((B, S, D), jnp.float32),
        grid_spec=pltpu.PrefetchScalarGridSpec(
            num_scalar_prefetch=0,
            grid=(num_blocks,),
            in_specs=[
                batch_spec, batch_spec,          # x, y
                ln_spec,                         # packed LN params
                qkv_spec,                        # packed Wq|Wk|Wv
                wo_spec,                         # Wo
            ],
            out_specs=batch_spec,
        ),
        compiler_params=pltpu.CompilerParams(
            dimension_semantics=("parallel",)),
    )(x, y, params["ln"], wqkv, params["wo"])


def contact_block_ref(x, y, params, *, heads_num, matmul_dtype=jnp.float32):
    """Pure-JAX reference.  matmul_dtype=bf16 mirrors the kernel's MXU precision."""
    B, S, D = x.shape
    Dh = D // heads_num
    lnp = params["ln"]

    def ln(v, g, b):
        mu = jnp.mean(v, axis=-1, keepdims=True)
        var = jnp.mean((v - mu) ** 2, axis=-1, keepdims=True)  # biased, like torch
        return (v - mu) / jnp.sqrt(var + 1e-5) * g + b

    def mm(a, b):
        return jnp.matmul(a.astype(matmul_dtype), b.astype(matmul_dtype),
                          preferred_element_type=jnp.float32)

    z = ln(x, lnp[0], lnp[1]) + ln(y, lnp[2], lnp[3])
    q = mm(z, params["wq"]) * (1.0 / math.sqrt(Dh))
    k = mm(z, params["wk"])
    v = mm(z, params["wv"])
    q = q.reshape(B, S, heads_num, Dh).transpose(0, 2, 1, 3)
    k = k.reshape(B, S, heads_num, Dh).transpose(0, 2, 1, 3)
    v = v.reshape(B, S, heads_num, Dh).transpose(0, 2, 1, 3)
    s = jnp.einsum("bhqd,bhkd->bhqk",
                   q.astype(matmul_dtype), k.astype(matmul_dtype),
                   preferred_element_type=jnp.float32)
    p = jax.nn.softmax(s, axis=-1)
    o = jnp.einsum("bhqk,bhkd->bhqd",
                   p.astype(matmul_dtype), v.astype(matmul_dtype),
                   preferred_element_type=jnp.float32)
    o = o.transpose(0, 2, 1, 3).reshape(B, S, D)
    return mm(o, params["wo"])


if __name__ == "__main__":
    # batch=2, seq=16, emb_dim=128 (lane-dense), heads=4 (head_dim=32)
    B, S, D, H = 2, 16, 128, 4

    key = jax.random.PRNGKey(0)
    kx, ky, kq, kk, kv, ko, kg = jax.random.split(key, 7)
    kg1, kg2, kg3, kg4 = jax.random.split(kg, 4)

    x = jax.random.normal(kx, (B, S, D), dtype=jnp.float32)
    y = jax.random.normal(ky, (B, S, D), dtype=jnp.float32)

    params = {
        # LayerNorm affine params packed as (4, D): [gx, bx, gy, by].
        # (Perturbed from torch's default 1/0 init so the affine path is exercised.)
        "ln": jnp.stack([
            1.0 + 0.1 * jax.random.normal(kg1, (D,), jnp.float32),   # gx
            0.1 * jax.random.normal(kg2, (D,), jnp.float32),         # bx
            1.0 + 0.1 * jax.random.normal(kg3, (D,), jnp.float32),   # gy
            0.1 * jax.random.normal(kg4, (D,), jnp.float32),         # by
        ]),
        # Projection weights stored as (in, out); bias=False.
        "wq": jax.random.normal(kq, (D, D), jnp.float32) / math.sqrt(D),
        "wk": jax.random.normal(kk, (D, D), jnp.float32) / math.sqrt(D),
        "wv": jax.random.normal(kv, (D, D), jnp.float32) / math.sqrt(D),
        "wo": jax.random.normal(ko, (D, D), jnp.float32) / math.sqrt(D),
    }

    out = jax.block_until_ready(contact_block(x, y, params, heads_num=H))
    assert out.shape == (B, S, D)

    # Same-precision reference (bf16 MXU operands, f32 accumulation) — tight check.
    ref_bf16 = contact_block_ref(x, y, params, heads_num=H, matmul_dtype=jnp.bfloat16)
    assert jnp.allclose(out, ref_bf16, atol=3e-2, rtol=3e-2), "mismatch vs bf16-matmul reference"

    # Pure-f32 reference — loose sanity check (difference is only bf16 operand rounding).
    ref_f32 = contact_block_ref(x, y, params, heads_num=H, matmul_dtype=jnp.float32)
    assert float(jnp.max(jnp.abs(out - ref_f32))) < 0.5, "gross mismatch vs f32 reference"

    print("KERNEL_OK")
</pallas_src>

<mosaic_0001>
module attributes {stable_mosaic.version = 11 : i64} {
  func.func @_contact_block_kernel(%arg0: i32, %arg1: memref<2x16x128xf32, #tpu.memory_space<vmem>>, %arg2: memref<2x16x128xf32, #tpu.memory_space<vmem>>, %arg3: memref<4x128xf32, #tpu.memory_space<vmem>>, %arg4: memref<128x384xf32, #tpu.memory_space<vmem>>, %arg5: memref<128x128xf32, #tpu.memory_space<vmem>>, %arg6: memref<2x16x128xf32, #tpu.memory_space<vmem>>) attributes {dimension_semantics = [#tpu.dimension_semantics<parallel>], iteration_bounds = array<i64: 1>, scalar_prefetch = 0 : i64, scratch_operands = 0 : i64, tpu.core_type = #tpu.core_type<tc>, window_params = [{transform_indices = @transform_0, window_bounds = array<i64: 2, 16, 128>}, {transform_indices = @transform_1, window_bounds = array<i64: 2, 16, 128>}, {pipeline_mode = #tpu.pipeline_mode<synchronous>, transform_indices = @transform_2, window_bounds = array<i64: 4, 128>}, {pipeline_mode = #tpu.pipeline_mode<synchronous>, transform_indices = @transform_3, window_bounds = array<i64: 128, 384>}, {pipeline_mode = #tpu.pipeline_mode<synchronous>, transform_indices = @transform_4, window_bounds = array<i64: 128, 128>}, {transform_indices = @transform_5, window_bounds = array<i64: 2, 16, 128>}]} {
    %c0 = arith.constant 0 : index
    %c0_0 = arith.constant 0 : index
    %c0_1 = arith.constant 0 : index
    %0 = vector.load %arg1[%c0, %c0_0, %c0_1] : memref<2x16x128xf32, #tpu.memory_space<vmem>>, vector<2x16x128xf32>
    %c0_2 = arith.constant 0 : index
    %c0_3 = arith.constant 0 : index
    %c0_4 = arith.constant 0 : index
    %1 = vector.load %arg2[%c0_2, %c0_3, %c0_4] : memref<2x16x128xf32, #tpu.memory_space<vmem>>, vector<2x16x128xf32>
    %c0_5 = arith.constant 0 : index
    %c0_6 = arith.constant 0 : index
    %2 = vector.load %arg3[%c0_5, %c0_6] : memref<4x128xf32, #tpu.memory_space<vmem>>, vector<4x128xf32>
    %3 = vector.extract_strided_slice %2 {offsets = [0, 0], sizes = [1, 128], strides = [1, 1]} : vector<4x128xf32> to vector<1x128xf32>
    %4 = vector.extract_strided_slice %2 {offsets = [1, 0], sizes = [1, 128], strides = [1, 1]} : vector<4x128xf32> to vector<1x128xf32>
    %5 = vector.extract_strided_slice %2 {offsets = [2, 0], sizes = [1, 128], strides = [1, 1]} : vector<4x128xf32> to vector<1x128xf32>
    %6 = vector.extract_strided_slice %2 {offsets = [3, 0], sizes = [1, 128], strides = [1, 1]} : vector<4x128xf32> to vector<1x128xf32>
    %cst = arith.constant dense<0.000000e+00> : vector<2x16xf32>
    %7 = vector.multi_reduction <add>, %0, %cst [2] : vector<2x16x128xf32> to vector<2x16xf32>
    %8 = vector.shape_cast %7 : vector<2x16xf32> to vector<2x16x1xf32>
    %cst_7 = arith.constant 1.280000e+02 : f32
    %9 = vector.broadcast %cst_7 : f32 to vector<2x16x1xf32>
    %10 = arith.divf %8, %9 : vector<2x16x1xf32>
    %11 = arith.mulf %0, %0 : vector<2x16x128xf32>
    %cst_8 = arith.constant dense<0.000000e+00> : vector<2x16xf32>
    %12 = vector.multi_reduction <add>, %11, %cst_8 [2] : vector<2x16x128xf32> to vector<2x16xf32>
    %13 = vector.shape_cast %12 : vector<2x16xf32> to vector<2x16x1xf32>
    %cst_9 = arith.constant 1.280000e+02 : f32
    %14 = vector.broadcast %cst_9 : f32 to vector<2x16x1xf32>
    %15 = arith.divf %13, %14 : vector<2x16x1xf32>
    %16 = arith.mulf %10, %10 : vector<2x16x1xf32>
    %17 = arith.subf %15, %16 : vector<2x16x1xf32>
    %18 = vector.broadcast %10 : vector<2x16x1xf32> to vector<2x16x128xf32>
    %19 = arith.subf %0, %18 : vector<2x16x128xf32>
    %cst_10 = arith.constant 9.99999974E-6 : f32
    %20 = vector.broadcast %cst_10 : f32 to vector<2x16x1xf32>
    %21 = arith.addf %17, %20 : vector<2x16x1xf32>
    %22 = math.rsqrt %21 : vector<2x16x1xf32>
    %23 = vector.broadcast %22 : vector<2x16x1xf32> to vector<2x16x128xf32>
    %24 = arith.mulf %19, %23 : vector<2x16x128xf32>
    %25 = vector.shape_cast %3 : vector<1x128xf32> to vector<1x1x128xf32>
    %26 = vector.broadcast %25 : vector<1x1x128xf32> to vector<2x16x128xf32>
    %27 = arith.mulf %24, %26 : vector<2x16x128xf32>
    %28 = vector.shape_cast %4 : vector<1x128xf32> to vector<1x1x128xf32>
    %29 = vector.broadcast %28 : vector<1x1x128xf32> to vector<2x16x128xf32>
    %30 = arith.addf %27, %29 : vector<2x16x128xf32>
    %cst_11 = arith.constant dense<0.000000e+00> : vector<2x16xf32>
    %31 = vector.multi_reduction <add>, %1, %cst_11 [2] : vector<2x16x128xf32> to vector<2x16xf32>
    %32 = vector.shape_cast %31 : vector<2x16xf32> to vector<2x16x1xf32>
    %cst_12 = arith.constant 1.280000e+02 : f32
    %33 = vector.broadcast %cst_12 : f32 to vector<2x16x1xf32>
    %34 = arith.divf %32, %33 : vector<2x16x1xf32>
    %35 = arith.mulf %1, %1 : vector<2x16x128xf32>
    %cst_13 = arith.constant dense<0.000000e+00> : vector<2x16xf32>
    %36 = vector.multi_reduction <add>, %35, %cst_13 [2] : vector<2x16x128xf32> to vector<2x16xf32>
    %37 = vector.shape_cast %36 : vector<2x16xf32> to vector<2x16x1xf32>
    %cst_14 = arith.constant 1.280000e+02 : f32
    %38 = vector.broadcast %cst_14 : f32 to vector<2x16x1xf32>
    %39 = arith.divf %37, %38 : vector<2x16x1xf32>
    %40 = arith.mulf %34, %34 : vector<2x16x1xf32>
    %41 = arith.subf %39, %40 : vector<2x16x1xf32>
    %42 = vector.broadcast %34 : vector<2x16x1xf32> to vector<2x16x128xf32>
    %43 = arith.subf %1, %42 : vector<2x16x128xf32>
    %cst_15 = arith.constant 9.99999974E-6 : f32
    %44 = vector.broadcast %cst_15 : f32 to vector<2x16x1xf32>
    %45 = arith.addf %41, %44 : vector<2x16x1xf32>
    %46 = math.rsqrt %45 : vector<2x16x1xf32>
    %47 = vector.broadcast %46 : vector<2x16x1xf32> to vector<2x16x128xf32>
    %48 = arith.mulf %43, %47 : vector<2x16x128xf32>
    %49 = vector.shape_cast %5 : vector<1x128xf32> to vector<1x1x128xf32>
    %50 = vector.broadcast %49 : vector<1x1x128xf32> to vector<2x16x128xf32>
    %51 = arith.mulf %48, %50 : vector<2x16x128xf32>
    %52 = vector.shape_cast %6 : vector<1x128xf32> to vector<1x1x128xf32>
    %53 = vector.broadcast %52 : vector<1x1x128xf32> to vector<2x16x128xf32>
    %54 = arith.addf %51, %53 : vector<2x16x128xf32>
    %55 = arith.addf %30, %54 : vector<2x16x128xf32>
    %56 = vector.shape_cast %55 : vector<2x16x128xf32> to vector<32x128xf32>
    %57 = arith.truncf %56 : vector<32x128xf32> to vector<32x128xbf16>
    %c0_16 = arith.constant 0 : index
    %c0_17 = arith.constant 0 : index
    %58 = vector.load %arg4[%c0_16, %c0_17] : memref<128x384xf32, #tpu.memory_space<vmem>>, vector<128x384xf32>
    %59 = arith.truncf %58 : vector<128x384xf32> to vector<128x384xbf16>
    %cst_18 = arith.constant dense<0.000000e+00> : vector<32x384xf32>
    %60 = tpu.matmul %57, %59, %cst_18 {dimension_numbers = #tpu.dot_dimension_numbers<[1], [0], [0], [1], [0, 0, 1, 1], [], []>} : vector<32x128xbf16>, vector<128x384xbf16>, vector<32x384xf32> -> vector<32x384xf32>
    %61 = vector.extract_strided_slice %60 {offsets = [0, 0], sizes = [32, 128], strides = [1, 1]} : vector<32x384xf32> to vector<32x128xf32>
    %62 = vector.extract_strided_slice %60 {offsets = [0, 128], sizes = [32, 128], strides = [1, 1]} : vector<32x384xf32> to vector<32x128xf32>
    %63 = vector.extract_strided_slice %60 {offsets = [0, 256], sizes = [32, 128], strides = [1, 1]} : vector<32x384xf32> to vector<32x128xf32>
    %cst_19 = arith.constant 0.176776692 : f32
    %64 = vector.broadcast %cst_19 : f32 to vector<32x128xf32>
    %65 = arith.mulf %61, %64 : vector<32x128xf32>
    %66 = vector.shape_cast %65 : vector<32x128xf32> to vector<2x16x4x32xf32>
    %67 = tpu.transpose %66, [0, 2, 1, 3] : vector<2x16x4x32xf32> -> vector<2x4x16x32xf32>
    %68 = vector.shape_cast %67 : vector<2x4x16x32xf32> to vector<8x16x32xf32>
    %69 = arith.truncf %68 : vector<8x16x32xf32> to vector<8x16x32xbf16>
    %70 = vector.shape_cast %62 : vector<32x128xf32> to vector<2x16x4x32xf32>
    %71 = tpu.transpose %70, [0, 2, 1, 3] : vector<2x16x4x32xf32> -> vector<2x4x16x32xf32>
    %72 = vector.shape_cast %71 : vector<2x4x16x32xf32> to vector<8x16x32xf32>
    %73 = arith.truncf %72 : vector<8x16x32xf32> to vector<8x16x32xbf16>
    %74 = vector.shape_cast %63 : vector<32x128xf32> to vector<2x16x4x32xf32>
    %75 = tpu.transpose %74, [0, 2, 1, 3] : vector<2x16x4x32xf32> -> vector<2x4x16x32xf32>
    %76 = vector.shape_cast %75 : vector<2x4x16x32xf32> to vector<8x16x32xf32>
    %77 = arith.truncf %76 : vector<8x16x32xf32> to vector<8x16x32xbf16>
    "tpu.trace_start"() <{level = 10 : i32, message = "bqd,bkd->bqk"}> : () -> ()
    %cst_20 = arith.constant dense<0.000000e+00> : vector<8x16x16xf32>
    %78 = tpu.matmul %69, %73, %cst_20 {dimension_numbers = #tpu.dot_dimension_numbers<[2], [2], [1], [1], [0, 0, 0, 1, 1, 1], [0], [0]>} : vector<8x16x32xbf16>, vector<8x16x32xbf16>, vector<8x16x16xf32> -> vector<8x16x16xf32>
    "tpu.trace_stop"() : () -> ()
    %cst_21 = arith.constant dense<0xFF800000> : vector<8x16xf32>
    %79 = vector.multi_reduction <maximumf>, %78, %cst_21 [2] : vector<8x16x16xf32> to vector<8x16xf32>
    %80 = vector.shape_cast %79 : vector<8x16xf32> to vector<8x16x1xf32>
    %81 = vector.broadcast %80 : vector<8x16x1xf32> to vector<8x16x16xf32>
    %82 = arith.subf %78, %81 : vector<8x16x16xf32>
    %83 = math.exp %82 : vector<8x16x16xf32>
    %cst_22 = arith.constant dense<0.000000e+00> : vector<8x16xf32>
    %84 = vector.multi_reduction <add>, %83, %cst_22 [2] : vector<8x16x16xf32> to vector<8x16xf32>
    %85 = vector.shape_cast %84 : vector<8x16xf32> to vector<8x16x1xf32>
    %86 = tpu.reciprocal %85 {approx = true} : vector<8x16x1xf32> -> vector<8x16x1xf32>
    %87 = vector.broadcast %86 : vector<8x16x1xf32> to vector<8x16x16xf32>
    %88 = arith.mulf %83, %87 : vector<8x16x16xf32>
    %89 = arith.truncf %88 : vector<8x16x16xf32> to vector<8x16x16xbf16>
    "tpu.trace_start"() <{level = 10 : i32, message = "bqk,bkd->bqd"}> : () -> ()
    %cst_23 = arith.constant dense<0.000000e+00> : vector<8x16x32xf32>
    %90 = tpu.matmul %89, %77, %cst_23 {dimension_numbers = #tpu.dot_dimension_numbers<[2], [1], [1], [2], [0, 0, 0, 1, 1, 2], [0], [0]>} : vector<8x16x16xbf16>, vector<8x16x32xbf16>, vector<8x16x32xf32> -> vector<8x16x32xf32>
    "tpu.trace_stop"() : () -> ()
    %91 = vector.shape_cast %90 : vector<8x16x32xf32> to vector<2x4x16x32xf32>
    %92 = tpu.transpose %91, [0, 2, 1, 3] : vector<2x4x16x32xf32> -> vector<2x16x4x32xf32>
    %93 = vector.shape_cast %92 : vector<2x16x4x32xf32> to vector<32x128xf32>
    %94 = arith.truncf %93 : vector<32x128xf32> to vector<32x128xbf16>
    %c0_24 = arith.constant 0 : index
    %c0_25 = arith.constant 0 : index
    %95 = vector.load %arg5[%c0_24, %c0_25] : memref<128x128xf32, #tpu.memory_space<vmem>>, vector<128x128xf32>
    %96 = arith.truncf %95 : vector<128x128xf32> to vector<128x128xbf16>
    %cst_26 = arith.constant dense<0.000000e+00> : vector<32x128xf32>
    %97 = tpu.matmul %94, %96, %cst_26 {dimension_numbers = #tpu.dot_dimension_numbers<[1], [0], [0], [1], [0, 0, 1, 1], [], []>} : vector<32x128xbf16>, vector<128x128xbf16>, vector<32x128xf32> -> vector<32x128xf32>
    %98 = vector.shape_cast %97 : vector<32x128xf32> to vector<2x16x128xf32>
    %c0_27 = arith.constant 0 : index
    %c0_28 = arith.constant 0 : index
    %c0_29 = arith.constant 0 : index
    %99 = vector.load %arg6[%c0_27, %c0_28, %c0_29] : memref<2x16x128xf32, #tpu.memory_space<vmem>>, vector<2x16x128xf32>
    tpu.vector_store %arg6[%c0_27, %c0_28, %c0_29], %98 {strides = array<i32>} : memref<2x16x128xf32, #tpu.memory_space<vmem>>, vector<2x16x128xf32>,
    return
  }
  func.func @transform_0(%arg0: i32) -> (i32, i32, i32) {
    %c0_i32 = arith.constant 0 : i32
    %c0_i32_0 = arith.constant 0 : i32
    %c0_i32_1 = arith.constant 0 : i32
    return %arg0, %c0_i32, %c0_i32_0 : i32, i32, i32
  }
  func.func @transform_1(%arg0: i32) -> (i32, i32, i32) {
    %c0_i32 = arith.constant 0 : i32
    %c0_i32_0 = arith.constant 0 : i32
    %c0_i32_1 = arith.constant 0 : i32
    return %arg0, %c0_i32, %c0_i32_0 : i32, i32, i32
  }
  func.func @transform_2(%arg0: i32) -> (i32, i32) {
    %c0_i32 = arith.constant 0 : i32
    %c0_i32_0 = arith.constant 0 : i32
    %c0_i32_1 = arith.constant 0 : i32
    return %c0_i32, %c0_i32_0 : i32, i32
  }
  func.func @transform_3(%arg0: i32) -> (i32, i32) {
    %c0_i32 = arith.constant 0 : i32
    %c0_i32_0 = arith.constant 0 : i32
    %c0_i32_1 = arith.constant 0 : i32
    return %c0_i32, %c0_i32_0 : i32, i32
  }
  func.func @transform_4(%arg0: i32) -> (i32, i32) {
    %c0_i32 = arith.constant 0 : i32
    %c0_i32_0 = arith.constant 0 : i32
    %c0_i32_1 = arith.constant 0 : i32
    return %c0_i32, %c0_i32_0 : i32, i32
  }
  func.func @transform_5(%arg0: i32) -> (i32, i32, i32) {
    %c0_i32 = arith.constant 0 : i32
    %c0_i32_0 = arith.constant 0 : i32
    %c0_i32_1 = arith.constant 0 : i32
    return %arg0, %c0_i32, %c0_i32_0 : i32, i32, i32
  }
}

</mosaic_0001>

<bundles_post_ra>
// kernel: tpu_custom_call.1
= control target key start
LH: loop header
LB: loop body
LE: loop exit
PB: predicated region body
PF: predicated region fallthrough
CT: control target
= control target key end

     0   :  { %10 = vsyncpa [#allocation3], 0  ;;  %s5438_s0 = inlined_call_operand.hbm [shape: f32[2,16,128], index: 0, kind: input, shape index: {}]   ;;  %s5439_s1 = inlined_call_operand.hbm [shape: f32[2,16,128], index: 1, kind: input, shape index: {}]   ;;  %s5440_s2 = inlined_call_operand.vmem [shape: f32[4,128], index: 2, kind: input, shape index: {}]   ;;  %s5441_s3 = inlined_call_operand.hbm [shape: f32[128,384], index: 3, kind: input, shape index: {}]   ;;  %s5442_s4 = inlined_call_operand.hbm [shape: f32[128,128], index: 4, kind: input, shape index: {}]   ;;  %s5443_s5 = inlined_call_operand.hbm [shape: f32[2,16,128], index: 5, kind: output, shape index: {}]  }
   0x1   :  { %11 = vsyncpa [#allocation6], 0 }
   0x2   :  { %12 = vsyncpa [#allocation9], 0 }
   0x3   :  { %13 = vsyncpa [#allocation4], 0  ;;  %s4282_s18 = smov [#allocation5]   ;;  %s4283_s20 = smov [#allocation2]  }
   0x4   :  { %s31_s19 = sshll.u32 %s4282_s18, 4  ;;  %s19_s21 = sshll.u32 %s4283_s20, 4  ;;  %s32_s19 = int_to_ptr.vmem [resolvable:$true] %s31_s19  ;;  %s4329_s21 = int_to_ptr.vmem [resolvable:$true] %s19_s21 }
   0x5   :  { %s4164_s24 = scalar_lea.hbm %s5439_s1, 512 }
   0x6   :  { %p4165_p0 = scmp.ne.s32.totalorder %s5439_s1, %s4164_s24  ;;  %p4168_p1 = scmp.lt.u32.totalorder %s4164_s24, %s5439_s1 }
   0x8   :  { %p4170_p2 = pnand %p4168_p1, %p4165_p0 }
   0xa   :  { %4173 = shalt.err (!%p4170_p2)
}
   0xb   :  { %s4174_s29 = scalar_lea.vmem %s32_s19, 512  ;;  %p4179_p4 = scmp.lt.s32.totalorder %s32_s19, %s32_s19 }
   0xc   :  { %p4175_p3 = scmp.ne.s32.totalorder %s32_s19, %s4174_s29  ;;  %p4180_p5 = scmp.lt.s32.totalorder %s4174_s29, %s4174_s29 }
   0xe   :  { %p4181_p6 = por %p4180_p5, %p4179_p4 }
  0x10   :  { %p4182_p7 = pnand %p4181_p6, %p4175_p3 }
  0x12   :  { %4185 = shalt.err (!%p4182_p7)
}
  0x13   :  { %s4284_s30 = smov 128   ;;  %s4285_s6 = smov 8  }
  0x14   :  { %37 = dma.hbm_to_vmem [thread:$0]  %s5439_s1, 512, %s32_s19, [#allocation6], %s4284_s30, %s4284_s30, %s4285_s6  }
  0x15   :  { %s4186_s11 = scalar_lea.hbm %s5438_s0, 512 }
  0x16   :  { %p4187_p8 = scmp.ne.s32.totalorder %s5438_s0, %s4186_s11  ;;  %p4190_p9 = scmp.lt.u32.totalorder %s4186_s11, %s5438_s0 }
  0x18   :  { %p4192_p10 = pnand %p4190_p9, %p4187_p8 }
  0x1a   :  { %4195 = shalt.err (!%p4192_p10)
}
  0x1b   :  { %s4196_s16 = scalar_lea.vmem %s4329_s21, 512  ;;  %p4201_p12 = scmp.lt.s32.totalorder %s4329_s21, %s4329_s21 }
  0x1c   :  { %p4197_p11 = scmp.ne.s32.totalorder %s4329_s21, %s4196_s16  ;;  %p4202_p13 = scmp.lt.s32.totalorder %s4196_s16, %s4196_s16 }
  0x1e   :  { %p4203_p0 = por %p4202_p13, %p4201_p12 }
  0x20   :  { %p4204_p1 = pnand %p4203_p0, %p4197_p11 }
  0x22   :  { %4207 = shalt.err (!%p4204_p1)
}
  0x23   :  { %25 = dma.hbm_to_vmem [thread:$0]  %s5438_s0, 512, %s4329_s21, [#allocation3], %s4284_s30, %s4284_s30, %s4285_s6  }
  0x24   :  { %s4286_s18 = smov [#allocation7]   ;;  %s4208_s23 = scalar_lea.hbm %s5441_s3, 6144 }
  0x25   :  { %s45_s19 = sshll.u32 %s4286_s18, 4  ;;  %p4209_p2 = scmp.ne.s32.totalorder %s5441_s3, %s4208_s23  ;;  %s46_s19 = int_to_ptr.vmem [resolvable:$true] %s45_s19 }
  0x26   :  { %p4212_p3 = scmp.lt.u32.totalorder %s4208_s23, %s5441_s3 }
  0x28   :  { %p4214_p4 = pnand %p4212_p3, %p4209_p2 }
  0x2a   :  { %4217 = shalt.err (!%p4214_p4)
}
  0x2b   :  { %s4218_s28 = scalar_lea.vmem %s46_s19, 6144  ;;  %p4223_p6 = scmp.lt.s32.totalorder %s46_s19, %s46_s19 }
  0x2c   :  { %p4219_p5 = scmp.ne.s32.totalorder %s46_s19, %s4218_s28  ;;  %p4224_p7 = scmp.lt.s32.totalorder %s4218_s28, %s4218_s28 }
  0x2e   :  { %p4225_p8 = por %p4224_p7, %p4223_p6 }
  0x30   :  { %p4226_p9 = pnand %p4225_p8, %p4219_p5 }
  0x32   :  { %4229 = shalt.err (!%p4226_p9)
}
  0x33   :  { %s4287_s0 = smov 384   ;;  %s4288_s21 = smov 24  }
  0x34   :  { %51 = dma.hbm_to_vmem [thread:$0]  %s5441_s3, 6144, %s46_s19, [#allocation6], %s4287_s0, %s4287_s0, %s4288_s21  }
  0x35   :  { %s4289_s8 = smov [#allocation8]   ;;  %s4230_s12 = scalar_lea.hbm %s5442_s4, 2048 }
  0x36   :  { %s57_s9 = sshll.u32 %s4289_s8, 4  ;;  %p4231_p10 = scmp.ne.s32.totalorder %s5442_s4, %s4230_s12  ;;  %s58_s9 = int_to_ptr.vmem [resolvable:$true] %s57_s9 }
  0x37   :  { %p4234_p11 = scmp.lt.u32.totalorder %s4230_s12, %s5442_s4 }
  0x39   :  { %p4236_p12 = pnand %p4234_p11, %p4231_p10 }
  0x3b   :  { %4239 = shalt.err (!%p4236_p12)
}
  0x3c   :  { %s4240_s1 = scalar_lea.vmem %s58_s9, 2048  ;;  %p4245_p0 = scmp.lt.s32.totalorder %s58_s9, %s58_s9 }
  0x3d   :  { %p4241_p13 = scmp.ne.s32.totalorder %s58_s9, %s4240_s1  ;;  %p4246_p1 = scmp.lt.s32.totalorder %s4240_s1, %s4240_s1 }
  0x3f   :  { %p4247_p2 = por %p4246_p1, %p4245_p0 }
  0x41   :  { %p4248_p3 = pnand %p4247_p2, %p4241_p13 }
  0x43   :  { %4251 = shalt.err (!%p4248_p3)
}
  0x44   :  { %63 = dma.hbm_to_vmem [thread:$0]  %s5442_s4, 2048, %s58_s9, [#allocation9], %s4284_s30, %s4284_s30, %s4285_s6  }
  0x45   :  { %4274 = dma.done.wait [#allocation3], 512  }
  0x46   :  { %4275 = vsyncadd [#allocation3], 4294966784 }
  0x47   :  { %4276 = dma.done.wait [#allocation6], 6656  }
  0x48   :  { %4277 = vsyncadd [#allocation6], 4294960640 }
  0x49   :  { %4278 = dma.done.wait [#allocation9], 2048  }
  0x4a   :  { %4279 = vsyncadd [#allocation9], 4294965248  ;;  %v4393_v0 = vld [vmem:[#allocation5] sm:$0xff]  ;;  %v4399_v2 = vld [vmem:[#allocation5 + $0x8] sm:$0xff]  ;;  %s4292_s19 = smov 96   ;;  %s4293_s20 = smov 32  }
  0x4b   :  { %v4395_v1 = vld [vmem:[#allocation2] sm:$0xff]  ;;  %155 = vadd.xlane.f32.xlu1 %v4393_v0  ;;  %v4401_v3 = vld [vmem:[#allocation2 + $0x8] sm:$0xff]  ;;  %v168_v6 = vmul.f32 %v4399_v2, %v4399_v2  ;;  %v167_v7 = vmul.f32 %v4393_v0, %v4393_v0  ;;  %v4413_v8 = vld [vmem:[#allocation2 + $0x18] sm:$0xff]  ;;  %vm4295_vm0 = vmmov 0   ;;  %vm2183_vm1 = vcmask 261120   ;;  %s4298_s22 = smov [#allocation10]  }
  0x4c   :  { %86 = vadd.xlane.f32.xlu0 %v4395_v1  ;;  %v100_v4 = vmul.f32 %v4401_v3, %v4401_v3  ;;  %v99_v5 = vmul.f32 %v4395_v1, %v4395_v1  ;;  %v4415_v9 = vld [vmem:[#allocation2 + $0x10] sm:$0xff]  ;;  %v4419_v10 = vld [vmem:[#allocation5 + $0x18] sm:$0xff]  ;;  %v230_v12 = vld [vmem:[#allocation7 + $0x8] sm:$0xff]  ;;  %v102_v15 = vmul.f32 %v4413_v8, %v4413_v8  ;;  %vm2560_vm2 = vcmask 130048   ;;  %s3787_s23 = sshll.u32 %s4298_s22, 4  ;;  %s3788_s23 = int_to_ptr.vmem [resolvable:$true] %s3787_s23 }
  0x4d   :  { %v4421_v11 = vld [vmem:[#allocation5 + $0x10] sm:$0xff]  ;;  %v233_v13 = vld [vmem:[#allocation7 + $0x20] sm:$0xff]  ;;  %v101_v16 = vmul.f32 %v4415_v9, %v4415_v9  ;;  %v232_v18 = vld [vmem:[#allocation7 + $0x18] sm:$0xff]  ;;  %v170_v22 = vmul.f32 %v4419_v10, %v4419_v10  ;;  %vm3693_vm3 = vcmask 523264   ;;  %vm3698_vm4 = vcmask 785408   ;;  %s4252_s24 = scalar_lea.vmem %s3788_s23, 512  ;;  %p4257_p5 = scmp.lt.s32.totalorder %s3788_s23, %s3788_s23 }
  0x4e   :  { %v278_v14 = vpack.c.bf16 %v233_v13, %v230_v12  ;;  %v229_v17 = vld [vmem:[#allocation7] sm:$0xff]  ;;  %v236_v20 = vld [vmem:[#allocation7 + $0x38] sm:$0xff]  ;;  %v239_v21 = vld [vmem:[#allocation7 + $0x50] sm:$0xff]  ;;  %v169_v23 = vmul.f32 %v4421_v11, %v4421_v11  ;;  %p4253_p4 = scmp.ne.s32.totalorder %s3788_s23, %s4252_s24  ;;  %p4258_p6 = scmp.lt.s32.totalorder %s4252_s24, %s4252_s24 }
  0x4f   :  { %157 = vadd.xlane.f32.xlu1 %v4399_v2  ;;  %v277_v19 = vpack.c.bf16 %v232_v18, %v229_v17  ;;  %v281_v24 = vpack.c.bf16 %v239_v21, %v236_v20  ;;  %v235_v25 = vld [vmem:[#allocation7 + $0x30] sm:$0xff]  ;;  %v238_v26 = vld [vmem:[#allocation7 + $0x48] sm:$0xff]  ;;  %v245_v29 = vld [vmem:[#allocation7 + $0x80] sm:$0xff]  ;;  %v4290_v20 = vmov 0  }
  0x50   :  { %88 = vadd.xlane.f32.xlu0 %v4401_v3  ;;  %301 = vmatprep.subr.bf16.mxu0 %v278_v14  ;;  %v280_v27 = vpack.c.bf16 %v238_v26, %v235_v25  ;;  %v242_v28 = vld [vmem:[#allocation7 + $0x68] sm:$0xff]  ;;  %v241_v31 = vld [vmem:[#allocation7 + $0x60] sm:$0xff]  ;;  %v244_v32 = vld [vmem:[#allocation7 + $0x78] sm:$0xff]  ;;  %p4259_p7 = por %p4258_p6, %p4257_p5 }
  0x51   :  { %302 = vmatpush1.bf16.msra.mxu0 %v277_v19  ;;  %v284_v30 = vpack.c.bf16 %v245_v29, %v242_v28  ;;  %v283_v33 = vpack.c.bf16 %v244_v32, %v241_v31  ;;  %v248_v34 = vld [vmem:[#allocation7 + $0x98] sm:$0xff]  ;;  %v251_v35 = vld [vmem:[#allocation7 + $0xb0] sm:$0xff]  ;;  %v250_v38 = vld [vmem:[#allocation7 + $0xa8] sm:$0xff]  ;;  %333 = vmatprep.mubr.bf16.mxu0 %v4290_v20 }
  0x52   :  { %303 = vmatprep.subr.bf16.mxu0 %v281_v24  ;;  %v287_v36 = vpack.c.bf16 %v251_v35, %v248_v34  ;;  %v247_v37 = vld [vmem:[#allocation7 + $0x90] sm:$0xff]  ;;  %v254_v40 = vld [vmem:[#allocation7 + $0xc8] sm:$0xff]  ;;  %v257_v41 = vld [vmem:[#allocation7 + $0xe0] sm:$0xff]  ;;  %p4260_p8 = pnand %p4259_p7, %p4253_p4 }
  0x53   :  { %105 = vadd.xlane.f32.xlu1 %v100_v4  ;;  %v286_v39 = vpack.c.bf16 %v250_v38, %v247_v37  ;;  %v231_v42 = vld [vmem:[#allocation7 + $0x10] sm:$0xff]  ;;  %v290_v43 = vpack.c.bf16 %v257_v41, %v254_v40  ;;  %v234_v44 = vld [vmem:[#allocation7 + $0x28] sm:$0xff]  ;;  %v253_v45 = vld [vmem:[#allocation7 + $0xc0] sm:$0xff] }
  0x54   :  { %103 = vadd.xlane.f32.xlu0 %v99_v5  ;;  %v256_v46 = vld [vmem:[#allocation7 + $0xd8] sm:$0xff]  ;;  %v279_v47 = vpack.c.bf16 %v234_v44, %v231_v42  ;;  %v263_v50 = vld [vmem:[#allocation7 + $0x110] sm:$0xff]  ;;  %v237_v51 = vld [vmem:[#allocation7 + $0x40] sm:$0xff] }
  0x55   :  { %304 = vmatpush1.bf16.msra.mxu0 %v280_v27  ;;  %v289_v48 = vpack.c.bf16 %v256_v46, %v253_v45  ;;  %v260_v49 = vld [vmem:[#allocation7 + $0xf8] sm:$0xff]  ;;  %v259_v54 = vld [vmem:[#allocation7 + $0xf0] sm:$0xff]  ;;  %v262_v55 = vld [vmem:[#allocation7 + $0x108] sm:$0xff] }
  0x56   :  { %305 = vmatprep.subr.bf16.mxu0 %v284_v30  ;;  %3901 = vmatprep.subr.bf16.mxu1 %v279_v47  ;;  %v293_v52 = vpack.c.bf16 %v263_v50, %v260_v49  ;;  %v240_v53 = vld [vmem:[#allocation7 + $0x58] sm:$0xff]  ;;  %v292_v57 = vpack.c.bf16 %v262_v55, %v259_v54  ;;  %v266_v58 = vld [vmem:[#allocation7 + $0x128] sm:$0xff]  ;;  %v269_v59 = vld [vmem:[#allocation7 + $0x140] sm:$0xff] }
  0x57   :  { %173 = vadd.xlane.f32.xlu1 %v168_v6  ;;  %3902 = vmatpush3.bf16.msra.mxu1 %v279_v47  ;;  %v282_v56 = vpack.c.bf16 %v240_v53, %v237_v51  ;;  %v243_v60 = vld [vmem:[#allocation7 + $0x70] sm:$0xff]  ;;  %v296_v61 = vpack.c.bf16 %v269_v59, %v266_v58  ;;  %v246_v62 = vld [vmem:[#allocation7 + $0x88] sm:$0xff]  ;;  %v265_v63 = vld [vmem:[#allocation7 + $0x120] sm:$0xff] }
  0x58   :  { %171 = vadd.xlane.f32.xlu0 %v167_v7  ;;  %v268_v4 = vld [vmem:[#allocation7 + $0x138] sm:$0xff]  ;;  %v285_v5 = vpack.c.bf16 %v246_v62, %v243_v60  ;;  %v275_v12 = vld [vmem:[#allocation7 + $0x170] sm:$0xff]  ;;  %v249_v13 = vld [vmem:[#allocation7 + $0xa0] sm:$0xff] }
  0x59   :  { %306 = vmatpush1.bf16.msra.mxu0 %v283_v33  ;;  %3903 = vmatprep.subr.bf16.mxu1 %v282_v56  ;;  %v295_v6 = vpack.c.bf16 %v268_v4, %v265_v63  ;;  %v272_v7 = vld [vmem:[#allocation7 + $0x158] sm:$0xff]  ;;  %v274_v17 = vld [vmem:[#allocation7 + $0x168] sm:$0xff]  ;;  %v255_v21 = vld [vmem:[#allocation7 + $0xd0] sm:$0xff] }
  0x5a   :  { %307 = vmatprep.subr.bf16.mxu0 %v287_v36  ;;  %v299_v14 = vpack.c.bf16 %v275_v12, %v272_v7  ;;  %v261_v24 = vld [vmem:[#allocation7 + $0x100] sm:$0xff]  ;;  %v264_v25 = vld [vmem:[#allocation7 + $0x118] sm:$0xff]  ;;  %v267_v27 = vld [vmem:[#allocation7 + $0x130] sm:$0xff] }
  0x5b   :  { %92 = vadd.xlane.f32.xlu1 %v4413_v8  ;;  %3904 = vmatpush3.bf16.msra.mxu1 %v282_v56  ;;  %v294_v26 = vpack.c.bf16 %v264_v25, %v261_v24  ;;  %v270_v28 = vld [vmem:[#allocation7 + $0x148] sm:$0xff]  ;;  %v273_v30 = vld [vmem:[#allocation7 + $0x160] sm:$0xff]  ;;  %v276_v31 = vld [vmem:[#allocation7 + $0x178] sm:$0xff] }
  0x5c   :  { %90 = vadd.xlane.f32.xlu0 %v4415_v9  ;;  %3905 = vmatprep.subr.bf16.mxu1 %v285_v5  ;;  %v297_v29 = vpack.c.bf16 %v270_v28, %v267_v27  ;;  %v300_v32 = vpack.c.bf16 %v276_v31, %v273_v30 }
  0x5d   :  { %308 = vmatpush1.bf16.msra.mxu0 %v286_v39 }
  0x5e   :  { %309 = vmatprep.subr.bf16.mxu0 %v290_v43 }
  0x5f   :  { %161 = vadd.xlane.f32.xlu1 %v4419_v10  ;;  %3906 = vmatpush3.bf16.msra.mxu1 %v285_v5 }
  0x60   :  { %159 = vadd.xlane.f32.xlu0 %v4421_v11 }
  0x61   :  { %310 = vmatpush1.bf16.msra.mxu0 %v289_v48 }
  0x62   :  { %311 = vmatprep.subr.bf16.mxu0 %v293_v52 }
  0x63   :  { %109 = vadd.xlane.f32.xlu1 %v102_v15  ;;  %v252_v15 = vld [vmem:[#allocation7 + $0xb8] sm:$0xff] }
  0x64   :  { %107 = vadd.xlane.f32.xlu0 %v101_v16  ;;  %v271_v16 = vld [vmem:[#allocation7 + $0x150] sm:$0xff]  ;;  %v288_v18 = vpack.c.bf16 %v252_v15, %v249_v13 }
  0x65   :  { %312 = vmatpush1.bf16.msra.mxu0 %v292_v57  ;;  %v298_v19 = vpack.c.bf16 %v274_v17, %v271_v16  ;;  %v139_v57 = vlaneseq }
  0x66   :  { %313 = vmatprep.subr.bf16.mxu0 %v296_v61  ;;  %3907 = vmatprep.subr.bf16.mxu1 %v288_v18 }
  0x67   :  { %177 = vadd.xlane.f32.xlu1 %v170_v22  ;;  %3908 = vmatpush3.bf16.msra.mxu1 %v288_v18  ;;  %v258_v22 = vld [vmem:[#allocation7 + $0xe8] sm:$0xff]  ;;  %v4442_v4 = vshrl.u32 %v139_v57, 7  ;;  %v85_v18 = vld [vmem:[%s5440_s2] sm:$0xf]  ;;  %s4291_s2 = smov 64  }
  0x68   :  { %175 = vadd.xlane.f32.xlu0 %v169_v23  ;;  %v291_v23 = vpack.c.bf16 %v258_v22, %v255_v21 }
  0x69   :  { %314 = vmatpush1.bf16.msra.mxu0 %v295_v6  ;;  %v209_v24 = vsub.s32 2, %v4442_v4 }
  0x6a   :  { %315 = vmatprep.subr.bf16.mxu0 %v299_v14  ;;  %3909 = vmatprep.subr.bf16.mxu1 %v291_v23  ;;  %v141_v14 = vsub.s32 0, %v4442_v4 }
  0x6b   :  { %3910 = vmatpush3.bf16.msra.mxu1 %v291_v23  ;;  %v149_v23 = vsub.s32 1, %v4442_v4 }
  0x6c   :  { %3911 = vmatprep.subr.bf16.mxu1 %v294_v26 }
  0x6d   :  { %316 = vmatpush1.bf16.msra.mxu0 %v298_v19 }
  0x6f   :  { %3912 = vmatpush3.bf16.msra.mxu1 %v294_v26 }
  0x70   :  { %3913 = vmatprep.subr.bf16.mxu1 %v297_v29 }
  0x73   :  { %3914 = vmatpush3.bf16.msra.mxu1 %v297_v29 }
  0x74   :  { %3915 = vmatprep.subr.bf16.mxu1 %v300_v32 }
  0x77   :  { %3916 = vmatpush3.bf16.msra.mxu1 %v300_v32  ;;  %v142_v32 = vrot.slane %v85_v18, %v141_v14 }
  0xd8   :  { %v156_v33 = vpop.xlane.xlu1 %155 }
  0xd9   :  { %v87_v34 = vpop.xlane.xlu0 %86  ;;  %v4434_v39 = vmul.f32 0.0078125, %v156_v33  ;;  %v217_v33 = vsub.s32 3, %v4442_v4 }
  0xda   :  { %v95_v37 = vmul.f32 0.0078125, %v87_v34 }
  0xdb   :  { %v183_v49 = vmul.f32 %v4434_v39, %v4434_v39 }
  0xdc   :  { %v158_v35 = vpop.xlane.xlu1 %157  ;;  %v115_v43 = vmul.f32 %v95_v37, %v95_v37  ;;  %v123_v26 = vsub.f32 %v4395_v1, %v95_v37 }
  0xdd   :  { %v89_v36 = vpop.xlane.xlu0 %88  ;;  %v4436_v40 = vmul.f32 0.0078125, %v158_v35 }
  0xde   :  { %v96_v38 = vmul.f32 0.0078125, %v89_v36 }
  0xdf   :  { %v184_v50 = vmul.f32 %v4436_v40, %v4436_v40  ;;  %v192_v1 = vsub.f32 %v4399_v2, %v4436_v40 }
  0xe0   :  { %v106_v41 = vpop.xlane.xlu1 %105  ;;  %v116_v44 = vmul.f32 %v96_v38, %v96_v38  ;;  %v124_v19 = vsub.f32 %v4401_v3, %v96_v38  ;;  %v191_v38 = vsub.f32 %v4393_v0, %v4434_v39 }
  0xe1   :  { %v104_v42 = vpop.xlane.xlu0 %103  ;;  %v112_v45 = vmul.f32 0.0078125, %v106_v41 }
  0xe2   :  { %v111_v46 = vmul.f32 0.0078125, %v104_v42  ;;  %v150_v42 = vrot.slane %v85_v18, %v149_v23 }
  0xe3   :  { %v120_v47 = vsub.f32 %v112_v45, %v116_v44 }
  0xe4   :  { %v119_v48 = vsub.f32 %v111_v46, %v115_v43  ;;  %v174_v51 = vpop.xlane.xlu1 %173  ;;  %v210_v43 = vrot.slane %v85_v18, %v209_v24 }
  0xe5   :  { %v172_v52 = vpop.xlane.xlu0 %171  ;;  %v128_v53 = vadd.f32 1e-05, %v120_v47  ;;  %v180_v55 = vmul.f32 0.0078125, %v174_v51 }
  0xe6   :  { %v127_v54 = vadd.f32 1e-05, %v119_v48  ;;  %v179_v56 = vmul.f32 0.0078125, %v172_v52 }
  0xe7   :  { %4084 = vrsqrt.f32 %v128_v53  ;;  %v188_v58 = vsub.f32 %v180_v55, %v184_v50  ;;  %v218_v53 = vrot.slane %v85_v18, %v217_v33 }
  0xe8   :  { %v187_v59 = vsub.f32 %v179_v56, %v183_v49  ;;  %4086 = vrsqrt.f32 %v127_v54  ;;  %v93_v60 = vpop.xlane.xlu1 %92 }
  0xe9   :  { %v91_v61 = vpop.xlane.xlu0 %90  ;;  %v196_v62 = vadd.f32 1e-05, %v188_v58  ;;  %v4444_v5 = vmul.f32 0.0078125, %v93_v60 }
  0xea   :  { %v195_v63 = vadd.f32 1e-05, %v187_v59  ;;  %v4446_v6 = vmul.f32 0.0078125, %v91_v61 }
  0xeb   :  { %4088 = vrsqrt.f32 %v196_v62  ;;  %v118_v15 = vmul.f32 %v4444_v5, %v4444_v5 }
  0xec   :  { %4090 = vrsqrt.f32 %v195_v63  ;;  %v162_v7 = vpop.xlane.xlu1 %161  ;;  %v117_v16 = vmul.f32 %v4446_v6, %v4446_v6  ;;  %v125_v14 = vsub.f32 %v4415_v9, %v4446_v6 }
  0xed   :  { %v160_v12 = vpop.xlane.xlu0 %159  ;;  %v4448_v13 = vmul.f32 0.0078125, %v162_v7  ;;  %v126_v7 = vsub.f32 %v4413_v8, %v4444_v5 }
  0xee   :  { %v4455_v17 = vmul.f32 0.0078125, %v160_v12 }
  0xef   :  { %v186_v30 = vmul.f32 %v4448_v13, %v4448_v13 }
  0xf0   :  { %v110_v21 = vpop.xlane.xlu1 %109  ;;  %v185_v3 = vmul.f32 %v4455_v17, %v4455_v17 }
  0xf1   :  { %v108_v22 = vpop.xlane.xlu0 %107  ;;  %v4085_v25 = vpop.eup %4084  ;;  %v114_v27 = vmul.f32 0.0078125, %v110_v21 }
  0xf2   :  { %v113_v28 = vmul.f32 0.0078125, %v108_v22  ;;  %v4087_v29 = vpop.eup %4086  ;;  %v136_v31 = vmul.f32 %v4085_v25, %v124_v19  ;;  %v194_v19 = vsub.f32 %v4419_v10, %v4448_v13  ;;  %v193_v22 = vsub.f32 %v4421_v11, %v4455_v17 }
  0xf3   :  { %v122_v34 = vsub.f32 %v114_v27, %v118_v15  ;;  %v135_v36 = vmul.f32 %v4087_v29, %v123_v26 }
  0xf4   :  { %v121_v35 = vsub.f32 %v113_v28, %v117_v16  ;;  %v178_v37 = vpop.xlane.xlu1 %177  ;;  %v144_v51 = vmul.f32 %v142_v32, %v136_v31 }
  0xf5   :  { %v176_v41 = vpop.xlane.xlu0 %175  ;;  %v4089_v44 = vpop.eup %4088  ;;  %v130_v45 = vadd.f32 1e-05, %v122_v34  ;;  %v182_v47 = vmul.f32 0.0078125, %v178_v37  ;;  %v143_v50 = vmul.f32 %v142_v32, %v135_v36 }
  0xf6   :  { %v129_v46 = vadd.f32 1e-05, %v121_v35  ;;  %v181_v48 = vmul.f32 0.0078125, %v176_v41  ;;  %v4091_v49 = vpop.eup %4090  ;;  %v204_v52 = vmul.f32 %v4089_v44, %v192_v1  ;;  %v152_v57 = vadd.f32 %v150_v42, %v144_v51 }
  0xf7   :  { %4092 = vrsqrt.f32 %v130_v45  ;;  %v190_v54 = vsub.f32 %v182_v47, %v186_v30  ;;  %v203_v39 = vmul.f32 %v4091_v49, %v191_v38  ;;  %v151_v59 = vadd.f32 %v150_v42, %v143_v50 }
  0xf8   :  { %v189_v0 = vsub.f32 %v181_v48, %v185_v3  ;;  %4094 = vrsqrt.f32 %v129_v46  ;;  %v212_v2 = vmul.f32 %v210_v43, %v204_v52  ;;  %v4296_v45 = vmov 1983009808  }
  0xf9   :  { %v198_v40 = vadd.f32 1e-05, %v190_v54  ;;  %v211_v56 = vmul.f32 %v210_v43, %v203_v39  ;;  %v450_v46 = vunpack.c.l.s4 %v4296_v45  ;;  %v4297_v47 = vmov 1934713408  }
  0xfa   :  { %v197_v55 = vadd.f32 1e-05, %v189_v0  ;;  %v220_v58 = vadd.f32 %v218_v53, %v212_v2  ;;  %v482_v48 = vunpack.c.l.s4 %v4297_v47 }
  0xfb   :  { %4096 = vrsqrt.f32 %v198_v40  ;;  %v219_v60 = vadd.f32 %v218_v53, %v211_v56  ;;  %v451_v49 = vunpack.c.0.s8 %v450_v46 }
  0xfc   :  { %4098 = vrsqrt.f32 %v197_v55  ;;  %v224_v61 = vadd.f32 %v220_v58, %v152_v57  ;;  %v483_v52 = vunpack.c.0.s8 %v482_v48 }
  0xfd   :  { %v223_v62 = vadd.f32 %v219_v60, %v151_v59 }
  0xfe   :  { %v4578_v56 = vsub.s32 %v483_v52, %v4442_v4 }
  0xff   :  { %v227_v63 = vpack.c.bf16 %v224_v61, %v223_v62 }
 0x101   :  { %v4093_v12 = vpop.eup %4092  ;;  %334 = vmatmul.mubr.bf16.vlgmr.msra.gmra.mrb[0].mxu0 %v227_v63  ;;  %3917 = vmatprep.mubr.bf16.mxu1 %v227_v63 }
 0x102   :  { %v4095_v15 = vpop.eup %4094  ;;  %343 = vmatprep.mubr.bf16.mxu0 %v4290_v20  ;;  %v138_v16 = vmul.f32 %v4093_v12, %v126_v7 }
 0x103   :  { %v137_v18 = vmul.f32 %v4095_v15, %v125_v14 }
 0x104   :  { %v146_v8 = vmul.f32 %v142_v32, %v138_v16 }
 0x105   :  { %v4097_v21 = vpop.eup %4096  ;;  %v145_v24 = vmul.f32 %v142_v32, %v137_v18 }
 0x106   :  { %v4099_v23 = vpop.eup %4098  ;;  %v206_v5 = vmul.f32 %v4097_v21, %v194_v19  ;;  %v154_v26 = vadd.f32 %v150_v42, %v146_v8 }
 0x107   :  { %v205_v25 = vmul.f32 %v4099_v23, %v193_v22  ;;  %v153_v28 = vadd.f32 %v150_v42, %v145_v24  ;;  %v4294_v42 = vmov 0.0  }
 0x108   :  { %v214_v9 = vmul.f32 %v210_v43, %v206_v5  ;;  %3921 = vmatprep.subr.bf16.mxu0 %v4294_v42  ;;  %3933 = vmatprep.subr.bf16.mxu1 %v4294_v42 }
 0x109   :  { %v213_v6 = vmul.f32 %v210_v43, %v205_v25 }
 0x10a   :  { %v222_v27 = vadd.f32 %v218_v53, %v214_v9 }
 0x10b   :  { %v221_v20 = vadd.f32 %v218_v53, %v213_v6  ;;  %v4573_v53 = vsub.s32 %v451_v49, %v4442_v4 }
 0x10c   :  { %v226_v29 = vadd.f32 %v222_v27, %v154_v26 }
 0x10d   :  { %v225_v30 = vadd.f32 %v221_v20, %v153_v28 }
 0x10f   :  { %v228_v31 = vpack.c.bf16 %v226_v29, %v225_v30 }
 0x111   :  { %344 = vmatmul.mubr.bf16.gmra.mrb[4].mxu0 %v228_v31  ;;  %3918 = vmatmul.mubr.bf16.vlgmr.msra.gmra.mrb[0].mxu1 %v228_v31 }
 0x112   :  { %3923 = vmatprep.mubr.msk.bf16.mxu0 %vm4295_vm0, %v4294_v42  ;;  %3935 = vmatprep.mubr.msk.bf16.mxu1 %vm4295_vm0, %v4294_v42 }
 0x1d4   :  { %v335_v10 = vpop.f32.mrb[0].mxu0 }
 0x1d5   :  { %v4482_v13 = vpop.f32.mrb[1].mxu0  ;;  %v4494_v32 = vmul.f32 0.17677669, %v335_v10 }
 0x1d6   :  { %1015 = vrot.lane.b32.xlu1 %v4482_v13, %s4291_s2  ;;  %1003 = vrot.lane.b32.xlu0 %v4482_v13, %s4292_s19  ;;  %v339_v11 = vpop.f32.mrb[2].mxu0 }
 0x1d7   :  { %v4488_v17 = vpop.f32.mrb[3].mxu0  ;;  %v4504_v33 = vmul.f32 0.17677669, %v339_v11 }
 0x1da   :  { %1027 = vrot.lane.b32.xlu0 %v4482_v13, %s4293_s20  ;;  %1005 = vrot.lane.b32.xlu1 %v4488_v17, %s4292_s19 }
 0x1de   :  { %411 = vrot.lane.b32.xlu0 %v4494_v32, %s4292_s19  ;;  %1017 = vrot.lane.b32.xlu1 %v4488_v17, %s4291_s2 }
 0x1e2   :  { %423 = vrot.lane.b32.xlu0 %v4494_v32, %s4291_s2  ;;  %1029 = vrot.lane.b32.xlu1 %v4488_v17, %s4293_s20 }
 0x1e4   :  { %v345_v3 = vpop.f32.mrb[4].mxu0  ;;  %v4506_v34 = vpop.f32.mrb[0].mxu1 }
 0x1e5   :  { %v4508_v35 = vpop.f32.mrb[5].mxu0  ;;  %v4510_v36 = vpop.f32.mrb[1].mxu1  ;;  %v4536_v43 = vmul.f32 0.17677669, %v345_v3 }
 0x1e6   :  { %435 = vrot.lane.b32.xlu0 %v4494_v32, %s4293_s20  ;;  %413 = vrot.lane.b32.xlu1 %v4504_v33, %s4292_s19  ;;  %v349_v38 = vpop.f32.mrb[6].mxu0  ;;  %v4516_v1 = vpop.f32.mrb[2].mxu1 }
 0x1e7   :  { %v4518_v37 = vpop.f32.mrb[7].mxu0  ;;  %v4520_v41 = vpop.f32.mrb[3].mxu1  ;;  %v4546_v44 = vmul.f32 0.17677669, %v349_v38 }
 0x1ea   :  { %425 = vrot.lane.b32.xlu1 %v4504_v33, %s4291_s2  ;;  %1007 = vrot.lane.b32.xlu0 %v4508_v35, %s4292_s19 }
 0x1ee   :  { %437 = vrot.lane.b32.xlu1 %v4504_v33, %s4293_s20  ;;  %1019 = vrot.lane.b32.xlu0 %v4508_v35, %s4291_s2 }
 0x1f2   :  { %1031 = vrot.lane.b32.xlu0 %v4508_v35, %s4293_s20  ;;  %1009 = vrot.lane.b32.xlu1 %v4518_v37, %s4292_s19 }
 0x1f6   :  { %415 = vrot.lane.b32.xlu0 %v4536_v43, %s4292_s19  ;;  %1021 = vrot.lane.b32.xlu1 %v4518_v37, %s4291_s2 }
 0x1fa   :  { %427 = vrot.lane.b32.xlu0 %v4536_v43, %s4291_s2  ;;  %1033 = vrot.lane.b32.xlu1 %v4518_v37, %s4293_s20 }
 0x1fe   :  { %439 = vrot.lane.b32.xlu0 %v4536_v43, %s4293_s20  ;;  %417 = vrot.lane.b32.xlu1 %v4546_v44, %s4292_s19 }
 0x202   :  { %1595 = vrot.lane.b32.xlu0 %v4510_v36, %s4292_s19  ;;  %429 = vrot.lane.b32.xlu1 %v4546_v44, %s4291_s2 }
 0x206   :  { %1619 = vrot.lane.b32.xlu0 %v4510_v36, %s4293_s20  ;;  %441 = vrot.lane.b32.xlu1 %v4546_v44, %s4293_s20 }
 0x20a   :  { %1597 = vrot.lane.b32.xlu1 %v4520_v41, %s4292_s19 }
 0x20e   :  { %1607 = vrot.lane.b32.xlu1 %v4510_v36, %s4291_s2 }
 0x212   :  { %1609 = vrot.lane.b32.xlu1 %v4520_v41, %s4291_s2 }
 0x216   :  { %1621 = vrot.lane.b32.xlu1 %v4520_v41, %s4293_s20 }
 0x248   :  { %v1016_v50 = vpop.permute.xlu1 %1015  ;;  %v1004_v51 = vpop.permute.xlu0 %1003 }
 0x249   :  { %v1039_v54 = vcombine.low %v4482_v13, %v1016_v50  ;;  %v1040_v0 = vcombine.high %v4482_v13, %v1016_v50 }
 0x24b   :  { %v1047_v57 = vrot.slane %v1039_v54, %v4573_v53  ;;  %v1054_v58 = vrot.slane %v1040_v0, %v4573_v53 }
 0x24c   :  { %v1006_v39 = vpop.permute.xlu1 %1005  ;;  %v1028_v2 = vpop.permute.xlu0 %1027 }
 0x24d   :  { %v1055_v40 = vcombine.low %v1004_v51, %v1028_v2  ;;  %v1056_v55 = vcombine.high %v1004_v51, %v1028_v2 }
 0x24f   :  { %v1063_v59 = vrot.slane %v1055_v40, %v4573_v53  ;;  %v1070_v60 = vrot.slane %v1056_v55, %v4573_v53 }
 0x250   :  { %v1018_v61 = vpop.permute.xlu1 %1017  ;;  %v412_v62 = vpop.permute.xlu0 %411 }
 0x251   :  { %v1071_v63 = vcombine.low %v1047_v57, %v1063_v59  ;;  %v1072_v7 = vcombine.high %v1047_v57, %v1063_v59  ;;  %v1087_v12 = vcombine.low %v1054_v58, %v1070_v60  ;;  %v1088_v14 = vcombine.high %v1054_v58, %v1070_v60 }
 0x252   :  { %v1107_v15 = vcombine.low %v4488_v17, %v1018_v61  ;;  %v1108_v21 = vcombine.high %v4488_v17, %v1018_v61 }
 0x253   :  { %v1079_v16 = vrot.slane %v1071_v63, %v4578_v56  ;;  %v1086_v4 = vrot.slane %v1072_v7, %v4578_v56  ;;  %v1095_v18 = vrot.slane %v1087_v12, %v4578_v56  ;;  %v1102_v19 = vrot.slane %v1088_v14, %v4578_v56 }
 0x254   :  { %v1115_v22 = vrot.slane %v1107_v15, %v4573_v53  ;;  %v1030_v23 = vpop.permute.xlu1 %1029  ;;  %v424_v8 = vpop.permute.xlu0 %423  ;;  %v1122_v10 = vrot.slane %v1108_v21, %v4573_v53 }
 0x255   :  { %v1311_v5 = vcombine.low %v1079_v16, %v1086_v4  ;;  %v3809_v24 = vcombine.high %v1079_v16, %v1086_v4  ;;  %v1327_v25 = vcombine.low %v1095_v18, %v1102_v19  ;;  %v3810_v9 = vcombine.high %v1095_v18, %v1102_v19 }
 0x256   :  { %v1123_v6 = vcombine.low %v1006_v39, %v1030_v23  ;;  %v1124_v26 = vcombine.high %v1006_v39, %v1030_v23  ;;  %v447_v27 = vcombine.low %v4494_v32, %v424_v8  ;;  %v448_v28 = vcombine.high %v4494_v32, %v424_v8 }
 0x257   :  { %v4594_v20 = vrot.slane %v1311_v5, %v4573_v53  ;;  %v4597_v29 = vrot.slane %v3809_v24, %v4573_v53  ;;  %v4600_v30 = vrot.slane %v1327_v25, %v4573_v53  ;;  %v4603_v31 = vrot.slane %v3810_v9, %v4573_v53 }
 0x258   :  { %v1131_v13 = vrot.slane %v1123_v6, %v4573_v53  ;;  %v1138_v11 = vrot.slane %v1124_v26, %v4573_v53  ;;  %v455_v17 = vrot.slane %v447_v27, %v4573_v53  ;;  %v414_v32 = vpop.permute.xlu1 %413  ;;  %v436_v3 = vpop.permute.xlu0 %435  ;;  %v462_v52 = vrot.slane %v448_v28, %v4573_v53 }
 0x259   :  { %v463_v38 = vcombine.low %v412_v62, %v436_v3  ;;  %v464_v45 = vcombine.high %v412_v62, %v436_v3  ;;  %v1343_v46 = vcombine.low %v4594_v20, %v4597_v29  ;;  %v1359_v47 = vcombine.low %v4600_v30, %v4603_v31 }
 0x25a   :  { %v1139_v48 = vcombine.low %v1115_v22, %v1131_v13  ;;  %v1140_v49 = vcombine.high %v1115_v22, %v1131_v13  ;;  %v1155_v50 = vcombine.low %v1122_v10, %v1138_v11  ;;  %v1156_v51 = vcombine.high %v1122_v10, %v1138_v11 }
 0x25b   :  { %v471_v54 = vrot.slane %v463_v38, %v4573_v53  ;;  %v478_v0 = vrot.slane %v464_v45, %v4573_v53  ;;  %v4617_v39 = vrot.slane %v1343_v46, %v4578_v56  ;;  %v4626_v15 = vrot.slane %v1359_v47, %v4578_v56 }
 0x25c   :  { %v1147_v2 = vrot.slane %v1139_v48, %v4578_v56  ;;  %v1154_v40 = vrot.slane %v1140_v49, %v4578_v56  ;;  %v1163_v55 = vrot.slane %v1155_v50, %v4578_v56  ;;  %v1170_v57 = vrot.slane %v1156_v51, %v4578_v56  ;;  %v426_v58 = vpop.permute.xlu1 %425  ;;  %v4623_v59 = vpop.permute.xlu0 %1007 }
 0x25d   :  { %v479_v60 = vcombine.low %v455_v17, %v471_v54  ;;  %v480_v61 = vcombine.high %v455_v17, %v471_v54  ;;  %v495_v62 = vcombine.low %v462_v52, %v478_v0  ;;  %v496_v63 = vcombine.high %v462_v52, %v478_v0 }
 0x25e   :  { %v1379_v7 = vcombine.low %v1147_v2, %v1154_v40  ;;  %v3811_v12 = vcombine.high %v1147_v2, %v1154_v40  ;;  %v1395_v14 = vcombine.low %v1163_v55, %v1170_v57  ;;  %v3812_v8 = vcombine.high %v1163_v55, %v1170_v57 }
 0x25f   :  { %v487_v16 = vrot.slane %v479_v60, %v4578_v56  ;;  %v494_v4 = vrot.slane %v480_v61, %v4578_v56  ;;  %v503_v18 = vrot.slane %v495_v62, %v4578_v56  ;;  %v510_v19 = vrot.slane %v496_v63, %v4578_v56 }
 0x260   :  { %v4633_v21 = vrot.slane %v1379_v7, %v4573_v53  ;;  %v4636_v22 = vrot.slane %v3811_v12, %v4573_v53  ;;  %v4639_v23 = vrot.slane %v1395_v14, %v4573_v53  ;;  %v438_v5 = vpop.permute.xlu1 %437  ;;  %v1020_v24 = vpop.permute.xlu0 %1019  ;;  %v515_v27 = vcombine.low %v4504_v33, %v426_v58 }
 0x261   :  { %v719_v25 = vcombine.low %v487_v16, %v494_v4  ;;  %v3801_v9 = vcombine.high %v487_v16, %v494_v4  ;;  %v735_v6 = vcombine.low %v503_v18, %v510_v19  ;;  %v3802_v26 = vcombine.high %v503_v18, %v510_v19 }
 0x262   :  { %v516_v28 = vcombine.high %v4504_v33, %v426_v58  ;;  %v531_v10 = vcombine.low %v414_v32, %v438_v5  ;;  %v532_v13 = vcombine.high %v414_v32, %v438_v5  ;;  %v523_v45 = vrot.slane %v515_v27, %v4573_v53 }
 0x263   :  { %v726_v11 = vrot.slane %v719_v25, %v4573_v53  ;;  %v734_v17 = vrot.slane %v3801_v9, %v4573_v53  ;;  %v742_v3 = vrot.slane %v735_v6, %v4573_v53  ;;  %v750_v38 = vrot.slane %v3802_v26, %v4573_v53 }
 0x264   :  { %v530_v46 = vrot.slane %v516_v28, %v4573_v53  ;;  %v539_v47 = vrot.slane %v531_v10, %v4573_v53  ;;  %v546_v48 = vrot.slane %v532_v13, %v4573_v53  ;;  %v4651_v49 = vpop.permute.xlu1 %1009  ;;  %v1032_v33 = vpop.permute.xlu0 %1031  ;;  %v4654_v55 = vrot.slane %v3812_v8, %v4573_v53 }
 0x265   :  { %v751_v32 = vcombine.low %v726_v11, %v734_v17  ;;  %v752_v50 = vcombine.high %v726_v11, %v734_v17  ;;  %v767_v51 = vcombine.low %v742_v3, %v750_v38  ;;  %v768_v52 = vcombine.high %v742_v3, %v750_v38 }
 0x266   :  { %v547_v54 = vcombine.low %v523_v45, %v539_v47  ;;  %v548_v0 = vcombine.high %v523_v45, %v539_v47  ;;  %v563_v2 = vcombine.low %v530_v46, %v546_v48  ;;  %v564_v40 = vcombine.high %v530_v46, %v546_v48 }
 0x267   :  { %v4657_v57 = vrot.slane %v751_v32, %v4578_v56  ;;  %v4660_v58 = vrot.slane %v752_v50, %v4578_v56  ;;  %v4663_v60 = vrot.slane %v767_v51, %v4578_v56  ;;  %v4670_v14 = vrot.slane %v768_v52, %v4578_v56 }
 0x268   :  { %v555_v61 = vrot.slane %v547_v54, %v4578_v56  ;;  %v562_v62 = vrot.slane %v548_v0, %v4578_v56  ;;  %v571_v63 = vrot.slane %v563_v2, %v4578_v56  ;;  %v578_v7 = vrot.slane %v564_v40, %v4578_v56  ;;  %v1022_v12 = vpop.permute.xlu1 %1021  ;;  %v4675_v9 = vpop.permute.xlu0 %415 }
 0x269   :  { %v1175_v16 = vcombine.low %v4508_v35, %v1020_v24  ;;  %v1176_v4 = vcombine.high %v4508_v35, %v1020_v24  ;;  %v1191_v18 = vcombine.low %v4623_v59, %v1032_v33  ;;  %v1192_v27 = vcombine.high %v4623_v59, %v1032_v33 }
 0x26a   :  { %v787_v19 = vcombine.low %v555_v61, %v562_v62  ;;  %v3803_v8 = vcombine.high %v555_v61, %v562_v62  ;;  %v803_v5 = vcombine.low %v571_v63, %v578_v7  ;;  %v3804_v25 = vcombine.high %v571_v63, %v578_v7 }
 0x26b   :  { %v1183_v6 = vrot.slane %v1175_v16, %v4573_v53  ;;  %v1190_v26 = vrot.slane %v1176_v4, %v4573_v53  ;;  %v1199_v28 = vrot.slane %v1191_v18, %v4573_v53  ;;  %v1206_v11 = vrot.slane %v1192_v27, %v4573_v53 }
 0x26c   :  { %v794_v10 = vrot.slane %v787_v19, %v4573_v53  ;;  %v802_v35 = vrot.slane %v3803_v8, %v4573_v53  ;;  %v810_v24 = vrot.slane %v803_v5, %v4573_v53  ;;  %v818_v13 = vrot.slane %v3804_v25, %v4573_v53  ;;  %v1034_v45 = vpop.permute.xlu1 %1033  ;;  %v428_v40 = vpop.permute.xlu0 %427 }
 0x26d   :  { %v1207_v17 = vcombine.low %v1183_v6, %v1199_v28  ;;  %v1208_v3 = vcombine.high %v1183_v6, %v1199_v28  ;;  %v1243_v38 = vcombine.low %v4518_v37, %v1022_v12  ;;  %v1223_v50 = vcombine.low %v1190_v26, %v1206_v11 }
 0x26e   :  { %v819_v46 = vcombine.low %v794_v10, %v802_v35  ;;  %v820_v47 = vcombine.high %v794_v10, %v802_v35  ;;  %v835_v59 = vcombine.low %v810_v24, %v818_v13  ;;  %v836_v48 = vcombine.high %v810_v24, %v818_v13 }
 0x26f   :  { %v1215_v33 = vrot.slane %v1207_v17, %v4578_v56  ;;  %v1222_v32 = vrot.slane %v1208_v3, %v4578_v56  ;;  %v1224_v51 = vcombine.high %v1190_v26, %v1206_v11  ;;  %v783_v52 = vcombine.low %v4657_v57, %v4663_v60 }
 0x270   :  { %v4692_v54 = vrot.slane %v819_v46, %v4578_v56  ;;  %v4695_v0 = vrot.slane %v820_v47, %v4578_v56  ;;  %v4698_v2 = vrot.slane %v835_v59, %v4578_v56  ;;  %v4701_v61 = vrot.slane %v1223_v50, %v4578_v56  ;;  %v4723_v26 = vpop.permute.xlu1 %417 }
 0x271   :  { %v4704_v62 = vrot.slane %v1224_v51, %v4578_v56  ;;  %v1447_v63 = vcombine.low %v1215_v33, %v1222_v32  ;;  %v3813_v7 = vcombine.high %v1215_v33, %v1222_v32  ;;  %v4707_v16 = vrot.slane %v836_v48, %v4578_v56 }
 0x272   :  { %v851_v4 = vcombine.low %v4692_v54, %v4698_v2  ;;  %v1244_v18 = vcombine.high %v4518_v37, %v1022_v12  ;;  %v1251_v19 = vrot.slane %v1243_v38, %v4573_v53  ;;  %v1375_v6 = vcombine.low %v4617_v39, %v4626_v15 }
 0x273   :  { %v4714_v8 = vrot.slane %v1447_v63, %v4573_v53  ;;  %v4717_v5 = vrot.slane %v3813_v7, %v4573_v53  ;;  %v1463_v25 = vcombine.low %v4701_v61, %v4704_v62  ;;  %v3814_v27 = vcombine.high %v4701_v61, %v4704_v62 }
 0x274   :  { %v1411_v37 = vcombine.low %v4633_v21, %v4636_v22  ;;  %v1427_v12 = vcombine.low %v4639_v23, %v4654_v55  ;;  %v1344_v28 = vcombine.high %v4594_v20, %v4597_v29  ;;  %v1258_v35 = vrot.slane %v1244_v18, %v4573_v53  ;;  %v440_v29 = vpop.permute.xlu0 %439 }
 0x275   :  { %v4734_v10 = vrot.slane %v1463_v25, %v4573_v53  ;;  %v1360_v24 = vcombine.high %v4600_v30, %v4603_v31  ;;  %v1412_v13 = vcombine.high %v4633_v21, %v4636_v22  ;;  %v1428_v20 = vcombine.high %v4639_v23, %v4654_v55 }
 0x276   :  { %v4742_v11 = vrot.slane %v1411_v37, %v4578_v56  ;;  %v4745_v17 = vrot.slane %v1427_v12, %v4578_v56  ;;  %v4748_v3 = vrot.slane %v1344_v28, %v4578_v56  ;;  %v1259_v31 = vcombine.low %v4651_v49, %v1034_v45 }
 0x277   :  { %v4753_v38 = vrot.slane %v1360_v24, %v4578_v56  ;;  %v4756_v30 = vrot.slane %v1412_v13, %v4578_v56  ;;  %v1260_v21 = vcombine.high %v4651_v49, %v1034_v45  ;;  %v4763_v46 = vrot.slane %v1428_v20, %v4578_v56  ;;  %v4772_v49 = vpop.permute.xlu1 %429 }
 0x278   :  { %v1443_v22 = vcombine.low %v4742_v11, %v4745_v17  ;;  %v583_v47 = vcombine.low %v4536_v43, %v428_v40  ;;  %v584_v23 = vcombine.high %v4536_v43, %v428_v40  ;;  %v1267_v59 = vrot.slane %v1259_v31, %v4573_v53 }
 0x279   :  { %v1377_v55 = vcombine.low %v4748_v3, %v4753_v38  ;;  %v1274_v48 = vrot.slane %v1260_v21, %v4573_v53  ;;  %v599_v33 = vcombine.low %v4675_v9, %v440_v29  ;;  %v1445_v32 = vcombine.low %v4756_v30, %v4763_v46 }
 0x27a   :  { %v1583_v45 = vpack.c.bf16 %v1443_v22, %v1375_v6  ;;  %v591_v50 = vrot.slane %v583_v47, %v4573_v53  ;;  %v598_v51 = vrot.slane %v584_v23, %v4573_v53  ;;  %v1275_v43 = vcombine.low %v1251_v19, %v1267_v59 }
 0x27b   :  { %v1276_v40 = vcombine.high %v1251_v19, %v1267_v59  ;;  %v1291_v61 = vcombine.low %v1258_v35, %v1274_v48  ;;  %v1292_v62 = vcombine.high %v1258_v35, %v1274_v48  ;;  %v1585_v7 = vpack.c.bf16 %v1445_v32, %v1377_v55  ;;  %v442_v21 = vpop.permute.xlu1 %441  ;;  %v1596_v32 = vpop.permute.xlu0 %1595 }
 0x27c   :  { %v2188_v63 = vsel %vm2183_vm1, %v1583_v45, 0  ;;  %v600_v18 = vcombine.high %v4675_v9, %v440_v29  ;;  %v607_v25 = vrot.slane %v599_v33, %v4573_v53  ;;  %v1283_v6 = vrot.slane %v1275_v43, %v4578_v56 }
 0x27d   :  { %3922 = vmatpush3.bf16.xpose.msra.mxu0 %v2188_v63  ;;  %v1290_v37 = vrot.slane %v1276_v40, %v4578_v56  ;;  %v1299_v12 = vrot.slane %v1291_v61, %v4578_v56  ;;  %v1306_v28 = vrot.slane %v1292_v62, %v4578_v56  ;;  %v2282_v19 = vsel %vm2183_vm1, %v1585_v7, 0 }
 0x27e   :  { %v614_v35 = vrot.slane %v600_v18, %v4573_v53  ;;  %v615_v24 = vcombine.low %v591_v50, %v607_v25  ;;  %v616_v13 = vcombine.high %v591_v50, %v607_v25  ;;  %3927 = vmatprep.subr.bf16.mxu0 %v4294_v42  ;;  %3934 = vmatpush3.bf16.xpose.msra.mxu1 %v2282_v19 }
 0x27f   :  { %v1515_v9 = vcombine.low %v1283_v6, %v1290_v37  ;;  %v3815_v20 = vcombine.high %v1283_v6, %v1290_v37  ;;  %v1531_v29 = vcombine.low %v1299_v12, %v1306_v28  ;;  %v3816_v31 = vcombine.high %v1299_v12, %v1306_v28  ;;  %3945 = vmatprep.subr.bf16.mxu1 %v4294_v42 }
 0x280   :  { %v623_v22 = vrot.slane %v615_v24, %v4578_v56  ;;  %v630_v47 = vrot.slane %v616_v13, %v4578_v56  ;;  %v631_v23 = vcombine.low %v598_v51, %v614_v35  ;;  %v632_v55 = vcombine.high %v598_v51, %v614_v35  ;;  %v1620_v24 = vpop.permute.xlu0 %1619 }
 0x281   :  { %v4792_v59 = vrot.slane %v3814_v27, %v4573_v53  ;;  %v4795_v48 = vrot.slane %v1515_v9, %v4573_v53  ;;  %v4798_v33 = vrot.slane %v3815_v20, %v4573_v53  ;;  %v4801_v45 = vrot.slane %v1531_v29, %v4573_v53 }
 0x282   :  { %v639_v50 = vrot.slane %v631_v23, %v4578_v56  ;;  %v646_v43 = vrot.slane %v632_v55, %v4578_v56  ;;  %v855_v51 = vcombine.low %v623_v22, %v630_v47  ;;  %v3805_v40 = vcombine.high %v623_v22, %v630_v47 }
 0x283   :  { %v4806_v61 = vrot.slane %v3816_v31, %v4573_v53  ;;  %v651_v27 = vcombine.low %v4546_v44, %v4772_v49  ;;  %v652_v62 = vcombine.high %v4546_v44, %v4772_v49  ;;  %v991_v63 = vpack.c.bf16 %v851_v4, %v783_v52  ;;  %v4828_v52 = vpop.permute.xlu1 %1597 }
 0x284   :  { %v862_v7 = vrot.slane %v855_v51, %v4573_v53  ;;  %v870_v18 = vrot.slane %v3805_v40, %v4573_v53  ;;  %v871_v25 = vcombine.low %v639_v50, %v646_v43  ;;  %v3806_v6 = vcombine.high %v639_v50, %v646_v43 }
 0x285   :  { %v659_v37 = vrot.slane %v651_v27, %v4573_v53  ;;  %3924 = vmatmul.mubr.msk.bf16.vlgmr.msra.gmra.mrb[8].mxu0 %vm2183_vm1, %v991_v63  ;;  %v1376_v44 = vcombine.high %v4617_v39, %v4626_v15  ;;  %v1444_v49 = vcombine.high %v4742_v11, %v4745_v17  ;;  %v785_v12 = vcombine.low %v4660_v58, %v4670_v14 }
 0x286   :  { %v4831_v4 = vrot.slane %v871_v25, %v4573_v53  ;;  %v4834_v28 = vrot.slane %v3806_v6, %v4573_v53  ;;  %v887_v19 = vcombine.low %v862_v7, %v870_v18  ;;  %v888_v35 = vcombine.high %v862_v7, %v870_v18  ;;  %3929 = vmatprep.mubr.msk.bf16.mxu0 %vm4295_vm0, %v4294_v42 }
 0x287   :  { %v1584_v39 = vpack.c.bf16 %v1444_v49, %v1376_v44  ;;  %v853_v15 = vcombine.low %v4695_v0, %v4707_v16  ;;  %v667_v11 = vcombine.low %v4723_v26, %v442_v21  ;;  %v668_v17 = vcombine.high %v4723_v26, %v442_v21 }
 0x288   :  { %v4843_v13 = vrot.slane %v887_v19, %v4578_v56  ;;  %v4846_v9 = vrot.slane %v888_v35, %v4578_v56  ;;  %v903_v20 = vcombine.low %v4831_v4, %v4834_v28  ;;  %v666_v29 = vrot.slane %v652_v62, %v4573_v53  ;;  %v1608_v62 = vpop.permute.xlu1 %1607 }
 0x289   :  { %v2235_v31 = vsel %vm2183_vm1, %v1584_v39, 0  ;;  %v993_v22 = vpack.c.bf16 %v853_v15, %v785_v12  ;;  %v675_v47 = vrot.slane %v667_v11, %v4573_v53  ;;  %v682_v23 = vrot.slane %v668_v17, %v4573_v53 }
 0x28a   :  { %v904_v26 = vcombine.high %v4831_v4, %v4834_v28  ;;  %v4857_v21 = vrot.slane %v903_v20, %v4578_v56  ;;  %3928 = vmatpush3.bf16.xpose.msra.mxu0 %v2235_v31  ;;  %v1647_v55 = vcombine.low %v1596_v32, %v1620_v24  ;;  %v1648_v50 = vcombine.high %v1596_v32, %v1620_v24 }
 0x28b   :  { %3936 = vmatmul.mubr.msk.bf16.vlgmr.msra.gmra.mrb[4].mxu1 %vm2183_vm1, %v993_v22  ;;  %v683_v43 = vcombine.low %v659_v37, %v675_v47  ;;  %v684_v51 = vcombine.high %v659_v37, %v675_v47  ;;  %v699_v40 = vcombine.low %v666_v29, %v682_v23  ;;  %v700_v27 = vcombine.high %v666_v29, %v682_v23 }
 0x28c   :  { %v1655_v63 = vrot.slane %v1647_v55, %v4573_v53  ;;  %v1662_v7 = vrot.slane %v1648_v50, %v4573_v53  ;;  %3939 = vmatprep.subr.bf16.mxu0 %v4294_v42  ;;  %v784_v18 = vcombine.high %v4657_v57, %v4663_v60  ;;  %v852_v25 = vcombine.high %v4692_v54, %v4698_v2  ;;  %v1610_v47 = vpop.permute.xlu1 %1609 }
 0x28d   :  { %v691_v32 = vrot.slane %v683_v43, %v4578_v56  ;;  %v698_v6 = vrot.slane %v684_v51, %v4578_v56  ;;  %v707_v37 = vrot.slane %v699_v40, %v4578_v56  ;;  %v714_v44 = vrot.slane %v700_v27, %v4578_v56  ;;  %3947 = vmatprep.mubr.msk.bf16.mxu1 %vm4295_vm0, %v4294_v42 }
 0x28e   :  { %v992_v49 = vpack.c.bf16 %v852_v25, %v784_v18  ;;  %v1378_v12 = vcombine.high %v4748_v3, %v4753_v38  ;;  %v1446_v57 = vcombine.high %v4756_v30, %v4763_v46  ;;  %v1631_v60 = vcombine.low %v4510_v36, %v1608_v62 }
 0x28f   :  { %v923_v54 = vcombine.low %v691_v32, %v698_v6  ;;  %v3807_v2 = vcombine.high %v691_v32, %v698_v6  ;;  %v939_v4 = vcombine.low %v707_v37, %v714_v44  ;;  %v3808_v28 = vcombine.high %v707_v37, %v714_v44 }
 0x290   :  { %v1586_v19 = vpack.c.bf16 %v1446_v57, %v1378_v12  ;;  %v1632_v35 = vcombine.high %v4510_v36, %v1608_v62  ;;  %v1639_v39 = vrot.slane %v1631_v60, %v4573_v53  ;;  %v1479_v15 = vcombine.low %v4714_v8, %v4717_v5 }
 0x291   :  { %v930_v11 = vrot.slane %v923_v54, %v4573_v53  ;;  %v938_v3 = vrot.slane %v3807_v2, %v4573_v53  ;;  %v946_v38 = vrot.slane %v939_v4, %v4573_v53  ;;  %v954_v30 = vrot.slane %v3808_v28, %v4573_v53  ;;  %3930 = vmatmul.mubr.msk.bf16.vlgmr.msra.gmra.mrb[12].mxu0 %vm2183_vm1, %v992_v49  ;;  %v1622_v28 = vpop.permute.xlu1 %1621 }
 0x292   :  { %v2329_v46 = vsel %vm2183_vm1, %v1586_v19, 0  ;;  %v1646_v17 = vrot.slane %v1632_v35, %v4573_v53  ;;  %v1663_v36 = vcombine.low %v1639_v39, %v1655_v63  ;;  %v1664_v24 = vcombine.high %v1639_v39, %v1655_v63  ;;  %3941 = vmatprep.mubr.msk.bf16.mxu0 %vm4295_vm0, %v4294_v42 }
 0x293   :  { %v955_v20 = vcombine.low %v930_v11, %v938_v3  ;;  %v956_v29 = vcombine.high %v930_v11, %v938_v3  ;;  %v971_v31 = vcombine.low %v946_v38, %v954_v30  ;;  %v972_v22 = vcombine.high %v946_v38, %v954_v30  ;;  %3940 = vmatpush3.bf16.xpose.msra.mxu0 %v2329_v46 }
 0x294   :  { %v1671_v23 = vrot.slane %v1663_v36, %v4578_v56  ;;  %v1678_v55 = vrot.slane %v1664_v24, %v4578_v56  ;;  %v1679_v50 = vcombine.low %v1646_v17, %v1662_v7  ;;  %v1680_v43 = vcombine.high %v1646_v17, %v1662_v7  ;;  %3951 = vmatprep.subr.bf16.mxu0 %v4294_v42 }
 0x295   :  { %v4895_v51 = vrot.slane %v904_v26, %v4578_v56  ;;  %v4898_v40 = vrot.slane %v955_v20, %v4578_v56  ;;  %v4901_v27 = vrot.slane %v956_v29, %v4578_v56  ;;  %v4904_v62 = vrot.slane %v971_v31, %v4578_v56 }
 0x296   :  { %v1687_v63 = vrot.slane %v1679_v50, %v4578_v56  ;;  %v1694_v18 = vrot.slane %v1680_v43, %v4578_v56  ;;  %v1903_v25 = vcombine.low %v1671_v23, %v1678_v55  ;;  %v3817_v7 = vcombine.high %v1671_v23, %v1678_v55 }
 0x297   :  { %v1487_v32 = vrot.slane %v1479_v15, %v4578_v56  ;;  %v1495_v26 = vcombine.low %v4734_v10, %v4792_v59  ;;  %v1547_v6 = vcombine.low %v4795_v48, %v4798_v33  ;;  %v1563_v37 = vcombine.low %v4801_v45, %v4806_v61 }
 0x298   :  { %v4916_v44 = vrot.slane %v972_v22, %v4578_v56  ;;  %v4919_v49 = vrot.slane %v1903_v25, %v4573_v53  ;;  %v1919_v12 = vcombine.low %v1687_v63, %v1694_v18  ;;  %v3818_v57 = vcombine.high %v1687_v63, %v1694_v18 }
 0x299   :  { %v1503_v60 = vrot.slane %v1495_v26, %v4578_v56  ;;  %v1555_v54 = vrot.slane %v1547_v6, %v4578_v56  ;;  %v1571_v2 = vrot.slane %v1563_v37, %v4578_v56  ;;  %v1699_v4 = vcombine.low %v4520_v41, %v1610_v47 }
 0x29a   :  { %v4926_v19 = vrot.slane %v3817_v7, %v4573_v53  ;;  %v4929_v35 = vrot.slane %v1919_v12, %v4573_v53  ;;  %v4932_v39 = vrot.slane %v3818_v57, %v4573_v53  ;;  %v1700_v15 = vcombine.high %v4520_v41, %v1610_v47 }
 0x29b   :  { %v1511_v11 = vcombine.low %v1487_v32, %v1503_v60  ;;  %v1579_v3 = vcombine.low %v1555_v54, %v1571_v2  ;;  %v786_v38 = vcombine.high %v4660_v58, %v4670_v14  ;;  %v854_v30 = vcombine.high %v4695_v0, %v4707_v16 }
 0x29c   :  { %v1707_v46 = vrot.slane %v1699_v4, %v4573_v53  ;;  %v1512_v17 = vcombine.high %v1487_v32, %v1503_v60  ;;  %v1580_v36 = vcombine.high %v1555_v54, %v1571_v2  ;;  %v1715_v24 = vcombine.low %v4828_v52, %v1622_v28 }
 0x29d   :  { %v1587_v20 = vpack.c.bf16 %v1579_v3, %v1511_v11  ;;  %v1714_v29 = vrot.slane %v1700_v15, %v4573_v53  ;;  %v994_v31 = vpack.c.bf16 %v854_v30, %v786_v38  ;;  %v1716_v41 = vcombine.high %v4828_v52, %v1622_v28 }
 0x29e   :  { %v1588_v22 = vpack.c.bf16 %v1580_v36, %v1512_v17  ;;  %v1723_v47 = vrot.slane %v1715_v24, %v4573_v53  ;;  %v919_v58 = vcombine.low %v4843_v13, %v4857_v21  ;;  %v987_v14 = vcombine.low %v4898_v40, %v4904_v62 }
 0x29f   :  { %v2376_v0 = vsel %vm2183_vm1, %v1587_v20, 0  ;;  %3942 = vmatmul.mubr.msk.bf16.vlgmr.msra.gmra.mrb[16].mxu0 %vm2183_vm1, %v994_v31  ;;  %v1730_v16 = vrot.slane %v1716_v41, %v4573_v53  ;;  %v920_v23 = vcombine.high %v4843_v13, %v4857_v21  ;;  %v1480_v52 = vcombine.high %v4714_v8, %v4717_v5 }
 0x2a0   :  { %3946 = vmatpush3.bf16.xpose.msra.mxu1 %v2376_v0  ;;  %v2423_v55 = vsel %vm2183_vm1, %v1588_v22, 0  ;;  %v1731_v50 = vcombine.low %v1707_v46, %v1723_v47  ;;  %v1732_v43 = vcombine.high %v1707_v46, %v1723_v47  ;;  %3953 = vmatprep.mubr.msk.bf16.mxu0 %vm4295_vm0, %v4294_v42  ;;  %v988_v63 = vcombine.high %v4898_v40, %v4904_v62 }
 0x2a1   :  { %3952 = vmatpush3.bf16.xpose.msra.mxu0 %v2423_v55  ;;  %v1747_v18 = vcombine.low %v1714_v29, %v1730_v16  ;;  %v1748_v25 = vcombine.high %v1714_v29, %v1730_v16  ;;  %3957 = vmatprep.subr.bf16.mxu1 %v4294_v42  ;;  %v995_v13 = vpack.c.bf16 %v987_v14, %v919_v58 }
 0x2a2   :  { %v1739_v21 = vrot.slane %v1731_v50, %v4578_v56  ;;  %v1746_v8 = vrot.slane %v1732_v43, %v4578_v56  ;;  %3963 = vmatprep.subr.bf16.mxu0 %v4294_v42  ;;  %v1494_v5 = vrot.slane %v1480_v52, %v4578_v56  ;;  %v1496_v7 = vcombine.high %v4734_v10, %v4792_v59 }
 0x2a3   :  { %v1755_v32 = vrot.slane %v1747_v18, %v4578_v56  ;;  %v1762_v40 = vrot.slane %v1748_v25, %v4578_v56  ;;  %v1548_v62 = vcombine.high %v4795_v48, %v4798_v33  ;;  %v1564_v26 = vcombine.high %v4801_v45, %v4806_v61 }
 0x2a4   :  { %v1971_v6 = vcombine.low %v1739_v21, %v1746_v8  ;;  %v3819_v37 = vcombine.high %v1739_v21, %v1746_v8  ;;  %v996_v12 = vpack.c.bf16 %v988_v63, %v920_v23  ;;  %v1510_v57 = vrot.slane %v1496_v7, %v4578_v56 }
 0x2a5   :  { %v1987_v60 = vcombine.low %v1755_v32, %v1762_v40  ;;  %v3820_v54 = vcombine.high %v1755_v32, %v1762_v40  ;;  %v1562_v2 = vrot.slane %v1548_v62, %v4578_v56  ;;  %v1578_v10 = vrot.slane %v1564_v26, %v4578_v56 }
 0x2a6   :  { %v1978_v59 = vrot.slane %v1971_v6, %v4573_v53  ;;  %v1986_v4 = vrot.slane %v3819_v37, %v4573_v53  ;;  %v1513_v28 = vcombine.low %v1494_v5, %v1510_v57  ;;  %v1514_v48 = vcombine.high %v1494_v5, %v1510_v57 }
 0x2a7   :  { %v1994_v33 = vrot.slane %v1987_v60, %v4573_v53  ;;  %v2002_v45 = vrot.slane %v3820_v54, %v4573_v53  ;;  %3948 = vmatmul.mubr.msk.bf16.vlgmr.msra.gmra.mrb[8].mxu1 %vm2183_vm1, %v995_v13  ;;  %v1581_v61 = vcombine.low %v1562_v2, %v1578_v10  ;;  %v1582_v15 = vcombine.high %v1562_v2, %v1578_v10 }
 0x2a8   :  { %3954 = vmatmul.mubr.msk.bf16.vlgmr.msra.gmra.mrb[20].mxu0 %vm2183_vm1, %v996_v12  ;;  %3959 = vmatprep.mubr.msk.bf16.mxu1 %vm4295_vm0, %v4294_v42  ;;  %v921_v11 = vcombine.low %v4846_v9, %v4895_v51  ;;  %v1935_v30 = vcombine.low %v4919_v49, %v4926_v19  ;;  %v1951_v46 = vcombine.low %v4929_v35, %v4932_v39 }
 0x2a9   :  { %v1589_v3 = vpack.c.bf16 %v1581_v61, %v1513_v28  ;;  %v1590_v38 = vpack.c.bf16 %v1582_v15, %v1514_v48  ;;  %3965 = vmatprep.mubr.msk.bf16.mxu0 %vm4295_vm0, %v4294_v42  ;;  %v989_v17 = vcombine.low %v4901_v27, %v4916_v44  ;;  %v990_v36 = vcombine.high %v4901_v27, %v4916_v44 }
 0x2aa   :  { %v2003_v24 = vcombine.low %v1978_v59, %v1986_v4  ;;  %v2019_v20 = vcombine.low %v1994_v33, %v2002_v45  ;;  %v1943_v41 = vrot.slane %v1935_v30, %v4578_v56  ;;  %v1959_v22 = vrot.slane %v1951_v46, %v4578_v56 }
 0x2ab   :  { %v2470_v29 = vsel %vm2183_vm1, %v1589_v3, 0  ;;  %v2517_v31 = vsel %vm2183_vm1, %v1590_v38, 0  ;;  %v1936_v14 = vcombine.high %v4919_v49, %v4926_v19  ;;  %v1952_v0 = vcombine.high %v4929_v35, %v4932_v39 }
 0x2ac   :  { %3958 = vmatpush3.bf16.xpose.msra.mxu1 %v2470_v29  ;;  %3964 = vmatpush3.bf16.xpose.msra.mxu0 %v2517_v31  ;;  %v2011_v47 = vrot.slane %v2003_v24, %v4578_v56  ;;  %v2027_v58 = vrot.slane %v2019_v20, %v4578_v56  ;;  %v1967_v27 = vcombine.low %v1943_v41, %v1959_v22 }
 0x2ad   :  { %3969 = vmatprep.subr.bf16.mxu1 %v4294_v42  ;;  %3975 = vmatprep.subr.bf16.mxu0 %v4294_v42  ;;  %v1968_v44 = vcombine.high %v1943_v41, %v1959_v22  ;;  %v1950_v52 = vrot.slane %v1936_v14, %v4578_v56  ;;  %v2004_v55 = vcombine.high %v1978_v59, %v1986_v4 }
 0x2ae   :  { %v2035_v16 = vcombine.low %v2011_v47, %v2027_v58  ;;  %v2036_v23 = vcombine.high %v2011_v47, %v2027_v58  ;;  %v922_v50 = vcombine.high %v4846_v9, %v4895_v51  ;;  %v1966_v43 = vrot.slane %v1952_v0, %v4578_v56 }
 0x2af   :  { %v2020_v49 = vcombine.high %v1994_v33, %v2002_v45  ;;  %v997_v19 = vpack.c.bf16 %v989_v17, %v921_v11  ;;  %v2018_v25 = vrot.slane %v2004_v55, %v4578_v56 }
 0x2b0   :  { %v2175_v63 = vpack.c.bf16 %v2035_v16, %v1967_v27  ;;  %v2176_v18 = vpack.c.bf16 %v2036_v23, %v1968_v44  ;;  %v998_v13 = vpack.c.bf16 %v990_v36, %v922_v50  ;;  %v1969_v21 = vcombine.low %v1950_v52, %v1966_v43 }
 0x2b1   :  { %v2034_v35 = vrot.slane %v2020_v49, %v4578_v56  ;;  %v1970_v39 = vcombine.high %v1950_v52, %v1966_v43 }
 0x2b3   :  { %3960 = vmatmul.mubr.msk.bf16.vlgmr.msra.gmra.mrb[12].mxu1 %vm2183_vm1, %v997_v19  ;;  %3966 = vmatmul.mubr.msk.bf16.vlgmr.msra.gmra.mrb[24].mxu0 %vm2183_vm1, %v998_v13  ;;  %v2037_v8 = vcombine.low %v2018_v25, %v2034_v35  ;;  %v2038_v5 = vcombine.high %v2018_v25, %v2034_v35 }
 0x2b4   :  { %3970 = vmatpush3.bf16.msra.mxu1 %v2175_v63  ;;  %3976 = vmatpush3.bf16.msra.mxu0 %v2176_v18 }
 0x2b5   :  { %3971 = vmatprep.mubr.msk.bf16.mxu1 %vm4295_vm0, %v4294_v42  ;;  %3981 = vmatprep.subr.bf16.mxu1 %v4294_v42  ;;  %v5019_v9 = vpack.c.bf16 %v2037_v8, %v1969_v21  ;;  %v5021_v51 = vpack.c.bf16 %v2038_v5, %v1970_v39 }
 0x2b6   :  { %3977 = vmatprep.mubr.msk.bf16.mxu0 %vm4295_vm0, %v4294_v42  ;;  %3987 = vmatprep.subr.bf16.mxu0 %v4294_v42 }
 0x358   :  { %v5026_v7 = vpop.f32.mrb[8].mxu0 }
 0x359   :  { %v3925_v32 = vpop.f32.mrb[9].mxu0  ;;  %v2561_v40 = vsel %vm2560_vm2, %v5026_v7, -inf }
 0x35a   :  { %2562 = vmax.xlane.f32.xlu0 %v2561_v40  ;;  %v5030_v62 = vpop.f32.mrb[10].mxu0 }
 0x35b   :  { %v3926_v26 = vpop.f32.mrb[11].mxu0  ;;  %v2564_v6 = vsel %vm2560_vm2, %v5030_v62, -inf }
 0x35c   :  { %2565 = vmax.xlane.f32.xlu1 %v2564_v6 }
 0x35e   :  { %v5034_v37 = vpop.f32.mrb[4].mxu1 }
 0x35f   :  { %v3937_v12 = vpop.f32.mrb[5].mxu1  ;;  %v2573_v57 = vsel %vm2560_vm2, %v5034_v37, -inf }
 0x360   :  { %v5038_v60 = vpop.f32.mrb[6].mxu1  ;;  %2574 = vmax.xlane.f32.xlu0 %v2573_v57 }
 0x361   :  { %v3938_v54 = vpop.f32.mrb[7].mxu1  ;;  %v2576_v2 = vsel %vm2560_vm2, %v5038_v60, -inf }
 0x362   :  { %2577 = vmax.xlane.f32.xlu1 %v2576_v2 }
 0x364   :  { %v5042_v10 = vpop.f32.mrb[12].mxu0 }
 0x365   :  { %v3931_v59 = vpop.f32.mrb[13].mxu0  ;;  %v2567_v4 = vsel %vm2560_vm2, %v5042_v10, -inf }
 0x366   :  { %2568 = vmax.xlane.f32.xlu0 %v2567_v4  ;;  %v5046_v28 = vpop.f32.mrb[14].mxu0 }
 0x367   :  { %v3932_v48 = vpop.f32.mrb[15].mxu0  ;;  %v2570_v31 = vsel %vm2560_vm2, %v5046_v28, -inf }
 0x372   :  { %v5048_v33 = vpop.f32.mrb[16].mxu0 }
 0x373   :  { %v3943_v45 = vpop.f32.mrb[17].mxu0  ;;  %v2579_v22 = vsel %vm2560_vm2, %v5048_v33, -inf }
 0x374   :  { %v5050_v61 = vpop.f32.mrb[18].mxu0 }
 0x375   :  { %v3944_v15 = vpop.f32.mrb[19].mxu0  ;;  %v2582_v41 = vsel %vm2560_vm2, %v5050_v61, -inf }
 0x37a   :  { %v5052_v11 = vpop.f32.mrb[8].mxu1 }
 0x37b   :  { %v5054_v3 = vpop.f32.mrb[20].mxu0  ;;  %v3949_v38 = vpop.f32.mrb[9].mxu1  ;;  %v2585_v30 = vsel %vm2560_vm2, %v5052_v11, -inf }
 0x37c   :  { %v3955_v46 = vpop.f32.mrb[21].mxu0  ;;  %2586 = vmax.xlane.f32.xlu0 %v2585_v30  ;;  %v5058_v17 = vpop.f32.mrb[10].mxu1  ;;  %v2591_v50 = vsel %vm2560_vm2, %v5054_v3, -inf }
 0x37d   :  { %v5060_v36 = vpop.f32.mrb[22].mxu0  ;;  %v3950_v24 = vpop.f32.mrb[11].mxu1  ;;  %v2588_v20 = vsel %vm2560_vm2, %v5058_v17, -inf }
 0x37e   :  { %v3956_v29 = vpop.f32.mrb[23].mxu0  ;;  %2589 = vmax.xlane.f32.xlu1 %v2588_v20  ;;  %v2594_v49 = vsel %vm2560_vm2, %v5060_v36, -inf }
 0x380   :  { %2571 = vmax.xlane.f32.xlu0 %v2570_v31 }
 0x382   :  { %2583 = vmax.xlane.f32.xlu1 %v2582_v41 }
 0x384   :  { %2580 = vmax.xlane.f32.xlu0 %v2579_v22 }
 0x386   :  { %v5070_v47 = vpop.f32.mrb[24].mxu0  ;;  %v5072_v58 = vpop.f32.mrb[12].mxu1 }
 0x387   :  { %v3961_v14 = vpop.f32.mrb[13].mxu1  ;;  %v3967_v27 = vpop.f32.mrb[25].mxu0  ;;  %v2597_v44 = vsel %vm2560_vm2, %v5072_v58, -inf  ;;  %v2603_v43 = vsel %vm2560_vm2, %v5070_v47, -inf }
 0x388   :  { %v5076_v0 = vpop.f32.mrb[26].mxu0  ;;  %v5078_v16 = vpop.f32.mrb[14].mxu1  ;;  %2598 = vmax.xlane.f32.xlu0 %v2597_v44 }
 0x389   :  { %v3962_v23 = vpop.f32.mrb[15].mxu1  ;;  %v3968_v52 = vpop.f32.mrb[27].mxu0  ;;  %v2600_v55 = vsel %vm2560_vm2, %v5078_v16, -inf  ;;  %v2606_v19 = vsel %vm2560_vm2, %v5076_v0, -inf }
 0x38a   :  { %2601 = vmax.xlane.f32.xlu1 %v2600_v55 }
 0x38c   :  { %2592 = vmax.xlane.f32.xlu0 %v2591_v50 }
 0x39b   :  { %1601 = vrot.lane.b32.xlu1 %v4516_v1, %s4292_s19 }
 0x39f   :  { %1611 = vrot.lane.b32.xlu1 %v4506_v34, %s4291_s2 }
 0x3a2   :  { %1599 = vrot.lane.b32.xlu0 %v4506_v34, %s4292_s19 }
 0x3c1   :  { %2604 = vmax.xlane.f32.xlu0 %v2603_v43 }
 0x3c3   :  { %2595 = vmax.xlane.f32.xlu1 %v2594_v49 }
 0x3c7   :  { %2607 = vmax.xlane.f32.xlu1 %v2606_v19 }
 0x3d7   :  { %1623 = vrot.lane.b32.xlu0 %v4506_v34, %s4293_s20 }
 0x3d8   :  { %1613 = vrot.lane.b32.xlu1 %v4516_v1, %s4291_s2 }
 0x3e7   :  { %v2563_v63 = vpop.xlane.xlu0 %2562 }
 0x3e8   :  { %v2609_v18 = vsub.f32 %v5026_v7, %v2563_v63 }
 0x3e9   :  { %v2566_v25 = vpop.xlane.xlu1 %2565 }
 0x3ea   :  { %v2625_v13 = vmul.f32 1.442695, %v2609_v18  ;;  %v2610_v21 = vsub.f32 %v5030_v62, %v2566_v25 }
 0x3ec   :  { %4100 = vpow2.f32 %v2625_v13  ;;  %v2627_v35 = vmul.f32 1.442695, %v2610_v21 }
 0x3ed   :  { %v2575_v39 = vpop.xlane.xlu0 %2574 }
 0x3ee   :  { %4102 = vpow2.f32 %v2627_v35  ;;  %v2613_v8 = vsub.f32 %v5034_v37, %v2575_v39 }
 0x3ef   :  { %v2578_v5 = vpop.xlane.xlu1 %2577 }
 0x3f0   :  { %v2633_v32 = vmul.f32 1.442695, %v2613_v8  ;;  %v2614_v40 = vsub.f32 %v5038_v60, %v2578_v5 }
 0x3f2   :  { %4104 = vpow2.f32 %v2633_v32  ;;  %v2635_v26 = vmul.f32 1.442695, %v2614_v40 }
 0x3f3   :  { %v2569_v6 = vpop.xlane.xlu0 %2568 }
 0x3f4   :  { %4106 = vpow2.f32 %v2635_v26  ;;  %v2611_v7 = vsub.f32 %v5042_v10, %v2569_v6 }
 0x3f6   :  { %v5105_v12 = vpop.eup %4100  ;;  %v2629_v57 = vmul.f32 1.442695, %v2611_v7 }
 0x3f7   :  { %v2657_v62 = vsel %vm2560_vm2, %v5105_v12, 0.0 }
 0x3f8   :  { %v5109_v54 = vpop.eup %4102  ;;  %4108 = vpow2.f32 %v2629_v57  ;;  %2658 = vadd.xlane.f32.xlu0 %v2657_v62 }
 0x3f9   :  { %v2660_v37 = vsel %vm2560_vm2, %v5109_v54, 0.0 }
 0x3fc   :  { %v5113_v60 = vpop.eup %4104  ;;  %2661 = vadd.xlane.f32.xlu1 %v2660_v37 }
 0x3fd   :  { %v2669_v2 = vsel %vm2560_vm2, %v5113_v60, 0.0 }
 0x3fe   :  { %v5117_v10 = vpop.eup %4106  ;;  %2670 = vadd.xlane.f32.xlu0 %v2669_v2 }
 0x3ff   :  { %v2672_v59 = vsel %vm2560_vm2, %v5117_v10, 0.0 }
 0x400   :  { %2673 = vadd.xlane.f32.xlu1 %v2672_v59 }
 0x402   :  { %v5121_v4 = vpop.eup %4108 }
 0x403   :  { %v2663_v48 = vsel %vm2560_vm2, %v5121_v4, 0.0 }
 0x404   :  { %2664 = vadd.xlane.f32.xlu0 %v2663_v48 }
 0x409   :  { %v2587_v45 = vpop.xlane.xlu0 %2586 }
 0x40a   :  { %v2617_v15 = vsub.f32 %v5052_v11, %v2587_v45 }
 0x40b   :  { %v2590_v38 = vpop.xlane.xlu1 %2589 }
 0x40c   :  { %v2641_v30 = vmul.f32 1.442695, %v2617_v15  ;;  %v2618_v46 = vsub.f32 %v5058_v17, %v2590_v38 }
 0x40d   :  { %v2572_v24 = vpop.xlane.xlu0 %2571 }
 0x40e   :  { %4110 = vpow2.f32 %v2641_v30  ;;  %v2612_v20 = vsub.f32 %v5046_v28, %v2572_v24  ;;  %v2643_v31 = vmul.f32 1.442695, %v2618_v46 }
 0x40f   :  { %v2584_v29 = vpop.xlane.xlu1 %2583 }
 0x410   :  { %v2631_v41 = vmul.f32 1.442695, %v2612_v20  ;;  %v2616_v22 = vsub.f32 %v5050_v61, %v2584_v29 }
 0x411   :  { %v2581_v14 = vpop.xlane.xlu0 %2580 }
 0x412   :  { %4112 = vpow2.f32 %v2631_v41  ;;  %v2615_v27 = vsub.f32 %v5048_v33, %v2581_v14  ;;  %v2639_v44 = vmul.f32 1.442695, %v2616_v22 }
 0x413   :  { %4114 = vpow2.f32 %v2643_v31 }
 0x414   :  { %v2637_v11 = vmul.f32 1.442695, %v2615_v27 }
 0x415   :  { %v2599_v23 = vpop.xlane.xlu0 %2598 }
 0x416   :  { %4116 = vpow2.f32 %v2637_v11  ;;  %v2621_v55 = vsub.f32 %v5072_v58, %v2599_v23 }
 0x417   :  { %v5130_v52 = vpop.xlane.xlu1 %2601  ;;  %4118 = vpow2.f32 %v2639_v44 }
 0x418   :  { %v5132_v17 = vpop.eup %4110  ;;  %v2622_v28 = vsub.f32 %v5078_v16, %v5130_v52  ;;  %v2649_v19 = vmul.f32 1.442695, %v2621_v55 }
 0x419   :  { %v2593_v61 = vpop.xlane.xlu0 %2592  ;;  %v2681_v50 = vsel %vm2560_vm2, %v5132_v17, 0.0 }
 0x41a   :  { %v2619_v33 = vsub.f32 %v5054_v3, %v2593_v61  ;;  %2682 = vadd.xlane.f32.xlu0 %v2681_v50 }
 0x41b   :  { %v5140_v43 = vpop.permute.xlu1 %1601 }
 0x41c   :  { %v5142_v49 = vpop.eup %4112  ;;  %v2645_v63 = vmul.f32 1.442695, %v2619_v33 }
 0x41d   :  { %v2666_v18 = vsel %vm2560_vm2, %v5142_v49, 0.0  ;;  %v5146_v25 = vpop.eup %4114  ;;  %v1600_v6 = vpop.permute.xlu0 %1599 }
 0x41e   :  { %4120 = vpow2.f32 %v2645_v63  ;;  %2667 = vadd.xlane.f32.xlu1 %v2666_v18  ;;  %v2684_v35 = vsel %vm2560_vm2, %v5146_v25, 0.0 }
 0x41f   :  { %v1612_v58 = vpop.permute.xlu1 %1611  ;;  %4122 = vpow2.f32 %v2649_v19 }
 0x420   :  { %v5148_v13 = vpop.eup %4116  ;;  %v1767_v3 = vcombine.low %v4506_v34, %v1612_v58  ;;  %v1768_v21 = vcombine.high %v4506_v34, %v1612_v58 }
 0x421   :  { %v2675_v39 = vsel %vm2560_vm2, %v5148_v13, 0.0  ;;  %v5156_v8 = vpop.eup %4118 }
 0x422   :  { %2685 = vadd.xlane.f32.xlu1 %v2684_v35  ;;  %2676 = vadd.xlane.f32.xlu0 %v2675_v39  ;;  %v2678_v5 = vsel %vm2560_vm2, %v5156_v8, 0.0  ;;  %v1775_v38 = vrot.slane %v1767_v3, %v4573_v53  ;;  %v1782_v30 = vrot.slane %v1768_v21, %v4573_v53 }
 0x426   :  { %2679 = vadd.xlane.f32.xlu0 %v2678_v5 }
 0x428   :  { %v5160_v32 = vpop.eup %4120 }
 0x429   :  { %v2687_v40 = vsel %vm2560_vm2, %v5160_v32, 0.0  ;;  %v5164_v34 = vpop.eup %4122 }
 0x42a   :  { %2688 = vadd.xlane.f32.xlu0 %v2687_v40  ;;  %v2693_v26 = vsel %vm2560_vm2, %v5164_v34, 0.0 }
 0x42e   :  { %2694 = vadd.xlane.f32.xlu0 %v2693_v26 }
 0x44e   :  { %v2605_v7 = vpop.xlane.xlu0 %2604 }
 0x44f   :  { %v2623_v57 = vsub.f32 %v5070_v47, %v2605_v7 }
 0x450   :  { %v2596_v62 = vpop.xlane.xlu1 %2595 }
 0x451   :  { %v2620_v37 = vsub.f32 %v5060_v36, %v2596_v62  ;;  %v2653_v2 = vmul.f32 1.442695, %v2623_v57 }
 0x452   :  { %v1624_v59 = vpop.permute.xlu0 %1623 }
 0x453   :  { %v2647_v48 = vmul.f32 1.442695, %v2620_v37  ;;  %4124 = vpow2.f32 %v2653_v2  ;;  %v1783_v45 = vcombine.low %v1600_v6, %v1624_v59  ;;  %v1784_v15 = vcombine.high %v1600_v6, %v1624_v59 }
 0x454   :  { %v2608_v46 = vpop.xlane.xlu1 %2607 }
 0x455   :  { %4126 = vpow2.f32 %v2647_v48  ;;  %v2624_v24 = vsub.f32 %v5076_v0, %v2608_v46  ;;  %v1791_v20 = vrot.slane %v1783_v45, %v4573_v53  ;;  %v1798_v47 = vrot.slane %v1784_v15, %v4573_v53 }
 0x456   :  { %v2651_v46 = vmul.f32 1.442695, %v2622_v28 }
 0x457   :  { %v2655_v29 = vmul.f32 1.442695, %v2624_v24  ;;  %v1799_v36 = vcombine.low %v1775_v38, %v1791_v20  ;;  %v1800_v31 = vcombine.high %v1775_v38, %v1791_v20  ;;  %v1815_v41 = vcombine.low %v1782_v30, %v1798_v47 }
 0x458   :  { %v1816_v22 = vcombine.high %v1782_v30, %v1798_v47  ;;  %v5175_v14 = vpop.permute.xlu1 %1613 }
 0x459   :  { %4128 = vpow2.f32 %v2655_v29  ;;  %v1807_v27 = vrot.slane %v1799_v36, %v4578_v56  ;;  %v1814_v44 = vrot.slane %v1800_v31, %v4578_v56  ;;  %v1823_v11 = vrot.slane %v1815_v41, %v4578_v56 }
 0x45a   :  { %v1830_v0 = vrot.slane %v1816_v22, %v4578_v56  ;;  %v1835_v23 = vcombine.low %v4516_v1, %v5175_v14  ;;  %v1836_v55 = vcombine.high %v4516_v1, %v5175_v14  ;;  %4130 = vpow2.f32 %v2651_v46 }
 0x45b   :  { %v2039_v61 = vcombine.low %v1807_v27, %v1814_v44  ;;  %v3821_v50 = vcombine.high %v1807_v27, %v1814_v44 }
 0x45c   :  { %v2055_v33 = vcombine.low %v1823_v11, %v1830_v0  ;;  %v3822_v19 = vcombine.high %v1823_v11, %v1830_v0 }
 0x45d   :  { %v5185_v63 = vpop.eup %4124  ;;  %v2046_v18 = vrot.slane %v2039_v61, %v4573_v53  ;;  %v2054_v58 = vrot.slane %v3821_v50, %v4573_v53 }
 0x45e   :  { %v2062_v3 = vrot.slane %v2055_v33, %v4573_v53  ;;  %v2070_v21 = vrot.slane %v3822_v19, %v4573_v53  ;;  %v2699_v35 = vsel %vm2560_vm2, %v5185_v63, 0.0 }
 0x45f   :  { %v5193_v39 = vpop.eup %4126  ;;  %2700 = vadd.xlane.f32.xlu0 %v2699_v35  ;;  %v2071_v5 = vcombine.low %v2046_v18, %v2054_v58  ;;  %v2072_v40 = vcombine.high %v2046_v18, %v2054_v58 }
 0x460   :  { %v2690_v26 = vsel %vm2560_vm2, %v5193_v39, 0.0  ;;  %v2087_v6 = vcombine.low %v2062_v3, %v2070_v21  ;;  %v2088_v7 = vcombine.high %v2062_v3, %v2070_v21 }
 0x461   :  { %2691 = vadd.xlane.f32.xlu1 %v2690_v26  ;;  %v5198_v57 = vrot.slane %v2071_v5, %v4578_v56  ;;  %v5201_v62 = vrot.slane %v2072_v40, %v4578_v56 }
 0x462   :  { %v5204_v37 = vrot.slane %v2087_v6, %v4578_v56  ;;  %v5207_v2 = vrot.slane %v2088_v7, %v4578_v56 }
 0x463   :  { %v5209_v59 = vpop.eup %4128 }
 0x464   :  { %v2702_v48 = vsel %vm2560_vm2, %v5209_v59, 0.0  ;;  %v2103_v45 = vcombine.low %v5198_v57, %v5204_v37  ;;  %v2104_v15 = vcombine.high %v5198_v57, %v5204_v37  ;;  %v2105_v38 = vcombine.low %v5201_v62, %v5207_v2  ;;  %v5226_v36 = vpop.eup %4130 }
 0x465   :  { %2703 = vadd.xlane.f32.xlu0 %v2702_v48  ;;  %v2106_v30 = vcombine.high %v5201_v62, %v5207_v2  ;;  %v2696_v16 = vsel %vm2560_vm2, %v5226_v36, 0.0 }
 0x472   :  { %1625 = vrot.lane.b32.xlu1 %v4516_v1, %s4293_s20 }
 0x485   :  { %v2659_v24 = vpop.xlane.xlu0 %2658 }
 0x486   :  { %4132 = vrcp.f32 %v2659_v24 }
 0x489   :  { %v2662_v20 = vpop.xlane.xlu1 %2661 }
 0x48a   :  { %4134 = vrcp.f32 %v2662_v20 }
 0x48b   :  { %v2671_v47 = vpop.xlane.xlu0 %2670 }
 0x48d   :  { %v2674_v29 = vpop.xlane.xlu1 %2673 }
 0x48e   :  { %4136 = vrcp.f32 %v2674_v29 }
 0x48f   :  { %4138 = vrcp.f32 %v2671_v47 }
 0x490   :  { %v4133_v31 = vpop.eup %4132 }
 0x491   :  { %v2721_v22 = vmul.f32 %v4133_v31, %v5105_v12  ;;  %v2665_v0 = vpop.xlane.xlu0 %2664 }
 0x492   :  { %4140 = vrcp.f32 %v2665_v0 }
 0x494   :  { %v4135_v41 = vpop.eup %4134 }
 0x495   :  { %v2722_v27 = vmul.f32 %v4135_v41, %v5109_v54 }
 0x496   :  { %2697 = vadd.xlane.f32.xlu1 %v2696_v16 }
 0x497   :  { %v2737_v52 = vpack.c.bf16 %v2722_v27, %v2721_v22 }
 0x498   :  { %v4137_v28 = vpop.eup %4136 }
 0x499   :  { %3972 = vmatmul.mubr.msk.bf16.vlgmr.msra.gmra.mrb[16].mxu1 %vm2560_vm2, %v2737_v52  ;;  %v4139_v44 = vpop.eup %4138  ;;  %v2726_v11 = vmul.f32 %v4137_v28, %v5117_v10 }
 0x49a   :  { %3982 = vmatpush3.bf16.msra.mxu1 %v5019_v9  ;;  %3983 = vmatprep.mubr.msk.bf16.mxu1 %vm4295_vm0, %v4294_v42  ;;  %v2725_v12 = vmul.f32 %v4139_v44, %v5113_v60 }
 0x49b   :  { %3993 = vmatprep.subr.bf16.mxu1 %v4294_v42 }
 0x49c   :  { %v2739_v54 = vpack.c.bf16 %v2726_v11, %v2725_v12  ;;  %v4141_v19 = vpop.eup %4140 }
 0x49d   :  { %v2723_v18 = vmul.f32 %v4141_v19, %v5121_v4 }
 0x4a1   :  { %3984 = vmatmul.mubr.msk.bf16.vlgmr.msra.gmra.mrb[20].mxu1 %vm2560_vm2, %v2739_v54 }
 0x4a2   :  { %3995 = vmatprep.mubr.msk.bf16.mxu1 %vm4295_vm0, %v4294_v42 }
 0x4a7   :  { %v2683_v61 = vpop.xlane.xlu0 %2682 }
 0x4ab   :  { %v2668_v50 = vpop.xlane.xlu1 %2667 }
 0x4ac   :  { %4142 = vrcp.f32 %v2668_v50 }
 0x4af   :  { %v2677_v9 = vpop.xlane.xlu0 %2676  ;;  %v2686_v4 = vpop.xlane.xlu1 %2685 }
 0x4b0   :  { %4144 = vrcp.f32 %v2677_v9 }
 0x4b3   :  { %v2680_v33 = vpop.xlane.xlu0 %2679 }
 0x4b4   :  { %4146 = vrcp.f32 %v2680_v33 }
 0x4b5   :  { %4148 = vrcp.f32 %v2683_v61 }
 0x4b6   :  { %v4143_v10 = vpop.eup %4142  ;;  %4150 = vrcp.f32 %v2686_v4 }
 0x4b7   :  { %v2724_v60 = vmul.f32 %v4143_v10, %v5142_v49  ;;  %v2689_v49 = vpop.xlane.xlu0 %2688 }
 0x4b9   :  { %v2738_v58 = vpack.c.bf16 %v2724_v60, %v2723_v18 }
 0x4ba   :  { %v4145_v3 = vpop.eup %4144 }
 0x4bb   :  { %3978 = vmatmul.mubr.msk.bf16.vlgmr.msra.gmra.mrb[28].mxu0 %vm2560_vm2, %v2738_v58  ;;  %v2727_v35 = vmul.f32 %v4145_v3, %v5148_v13  ;;  %v1843_v13 = vrot.slane %v1835_v23, %v4573_v53 }
 0x4bc   :  { %3988 = vmatpush3.bf16.msra.mxu0 %v5021_v51  ;;  %3989 = vmatprep.mubr.msk.bf16.mxu0 %vm4295_vm0, %v4294_v42  ;;  %v5254_v51 = vpop.xlane.xlu0 %2694 }
 0x4bd   :  { %3999 = vmatprep.subr.bf16.mxu0 %v4294_v42 }
 0x4be   :  { %v4147_v21 = vpop.eup %4146 }
 0x4bf   :  { %v2728_v5 = vmul.f32 %v4147_v21, %v5156_v8  ;;  %v1850_v8 = vrot.slane %v1836_v55, %v4573_v53  ;;  %v4149_v54 = vpop.eup %4148 }
 0x4c0   :  { %v4151_v0 = vpop.eup %4150 }
 0x4c1   :  { %v2740_v40 = vpack.c.bf16 %v2728_v5, %v2727_v35  ;;  %v2730_v4 = vmul.f32 %v4151_v0, %v5146_v25  ;;  %v2729_v25 = vmul.f32 %v4149_v54, %v5132_v17 }
 0x4c3   :  { %3990 = vmatmul.mubr.msk.bf16.vlgmr.msra.gmra.mrb[32].mxu0 %vm2560_vm2, %v2740_v40 }
 0x4c4   :  { %4001 = vmatprep.mubr.msk.bf16.mxu0 %vm4295_vm0, %v4294_v42 }
 0x4ec   :  { %v2701_v46 = vpop.xlane.xlu0 %2700 }
 0x4ee   :  { %v2692_v26 = vpop.xlane.xlu1 %2691 }
 0x4ef   :  { %4152 = vrcp.f32 %v2692_v26 }
 0x4f0   :  { %4154 = vrcp.f32 %v2689_v49 }
 0x4f2   :  { %v1626_v6 = vpop.permute.xlu1 %1625  ;;  %v2704_v52 = vpop.xlane.xlu0 %2703 }
 0x4f3   :  { %v1851_v7 = vcombine.low %v5140_v43, %v1626_v6  ;;  %v1852_v48 = vcombine.high %v5140_v43, %v1626_v6  ;;  %4156 = vrcp.f32 %v2704_v52 }
 0x4f4   :  { %4158 = vrcp.f32 %v2701_v46 }
 0x4f5   :  { %v1859_v24 = vrot.slane %v1851_v7, %v4573_v53  ;;  %v1866_v20 = vrot.slane %v1852_v48, %v4573_v53  ;;  %4160 = vrcp.f32 %v5254_v51 }
 0x4f7   :  { %v1867_v47 = vcombine.low %v1843_v13, %v1859_v24  ;;  %v1868_v43 = vcombine.high %v1843_v13, %v1859_v24  ;;  %v1883_v29 = vcombine.low %v1850_v8, %v1866_v20  ;;  %v1884_v31 = vcombine.high %v1850_v8, %v1866_v20 }
 0x4f9   :  { %v1875_v23 = vrot.slane %v1867_v47, %v4578_v56  ;;  %v1882_v41 = vrot.slane %v1868_v43, %v4578_v56  ;;  %v1891_v22 = vrot.slane %v1883_v29, %v4578_v56  ;;  %v1898_v1 = vrot.slane %v1884_v31, %v4578_v56  ;;  %v4153_v19 = vpop.eup %4152 }
 0x4fa   :  { %v4155_v3 = vpop.eup %4154  ;;  %v2732_v49 = vmul.f32 %v4153_v19, %v5193_v39 }
 0x4fb   :  { %v2107_v14 = vcombine.low %v1875_v23, %v1882_v41  ;;  %v3823_v55 = vcombine.high %v1875_v23, %v1882_v41  ;;  %v2123_v27 = vcombine.low %v1891_v22, %v1898_v1  ;;  %v3824_v16 = vcombine.high %v1891_v22, %v1898_v1 }
 0x4fc   :  { %v2731_v39 = vmul.f32 %v4155_v3, %v5160_v32 }
 0x4fd   :  { %v2114_v28 = vrot.slane %v2107_v14, %v4573_v53  ;;  %v2122_v44 = vrot.slane %v3823_v55, %v4573_v53  ;;  %v2130_v11 = vrot.slane %v2123_v27, %v4573_v53  ;;  %v2138_v12 = vrot.slane %v3824_v16, %v4573_v53  ;;  %v4157_v13 = vpop.eup %4156 }
 0x4fe   :  { %v2742_v8 = vpack.c.bf16 %v2732_v49, %v2731_v39  ;;  %v4159_v57 = vpop.eup %4158  ;;  %v2736_v17 = vmul.f32 %v4157_v13, %v5209_v59 }
 0x4ff   :  { %v2139_v61 = vcombine.low %v2114_v28, %v2122_v44  ;;  %v2155_v50 = vcombine.low %v2130_v11, %v2138_v12  ;;  %v2140_v9 = vcombine.high %v2114_v28, %v2122_v44  ;;  %v2156_v33 = vcombine.high %v2130_v11, %v2138_v12  ;;  %v4161_v2 = vpop.eup %4160 }
 0x500   :  { %v2735_v32 = vmul.f32 %v4159_v57, %v5185_v63 }
 0x501   :  { %v2147_v10 = vrot.slane %v2139_v61, %v4578_v56  ;;  %v2163_v18 = vrot.slane %v2155_v50, %v4578_v56  ;;  %v2154_v60 = vrot.slane %v2140_v9, %v4578_v56  ;;  %v2170_v58 = vrot.slane %v2156_v33, %v4578_v56 }
 0x502   :  { %v2744_v62 = vpack.c.bf16 %v2736_v17, %v2735_v32 }
 0x503   :  { %v2171_v21 = vcombine.low %v2147_v10, %v2163_v18  ;;  %v2172_v35 = vcombine.high %v2147_v10, %v2163_v18  ;;  %v2173_v5 = vcombine.low %v2154_v60, %v2170_v58  ;;  %v2174_v40 = vcombine.high %v2154_v60, %v2170_v58 }
 0x505   :  { %v2179_v26 = vpack.c.bf16 %v2171_v21, %v2103_v45  ;;  %v2180_v6 = vpack.c.bf16 %v2172_v35, %v2104_v15  ;;  %v2181_v7 = vpack.c.bf16 %v2173_v5, %v2105_v38  ;;  %v2182_v48 = vpack.c.bf16 %v2174_v40, %v2106_v30 }
 0x506   :  { %v2741_v45 = vpack.c.bf16 %v2730_v4, %v2729_v25  ;;  %v2733_v38 = vmul.f32 %v4161_v2, %v5164_v34 }
 0x507   :  { %3994 = vmatpush3.bf16.msra.mxu1 %v2179_v26  ;;  %4000 = vmatpush3.bf16.msra.mxu0 %v2180_v6 }
 0x508   :  { %4005 = vmatprep.subr.bf16.mxu1 %v4294_v42  ;;  %4011 = vmatprep.subr.bf16.mxu0 %v4294_v42 }
 0x50a   :  { %3996 = vmatmul.mubr.msk.bf16.vlgmr.msra.gmra.mrb[24].mxu1 %vm2560_vm2, %v2741_v45  ;;  %4002 = vmatmul.mubr.msk.bf16.vlgmr.msra.gmra.mrb[36].mxu0 %vm2560_vm2, %v2742_v8 }
 0x50b   :  { %4006 = vmatpush3.bf16.msra.mxu1 %v2181_v7  ;;  %4012 = vmatpush3.bf16.msra.mxu0 %v2182_v48 }
 0x50c   :  { %4013 = vmatprep.mubr.msk.bf16.mxu0 %vm4295_vm0, %v4294_v42  ;;  %4007 = vmatprep.mubr.msk.bf16.mxu1 %vm4295_vm0, %v4294_v42 }
 0x512   :  { %4014 = vmatmul.mubr.msk.bf16.vlgmr.msra.gmra.mrb[40].mxu0 %vm2560_vm2, %v2744_v62 }
 0x523   :  { %v2698_v37 = vpop.xlane.xlu1 %2697 }
 0x524   :  { %4162 = vrcp.f32 %v2698_v37 }
 0x52e   :  { %v4163_v15 = vpop.eup %4162 }
 0x52f   :  { %v2734_v59 = vmul.f32 %v4163_v15, %v5226_v36 }
 0x531   :  { %v2743_v30 = vpack.c.bf16 %v2734_v59, %v2733_v38 }
 0x533   :  { %4008 = vmatmul.mubr.msk.bf16.vlgmr.msra.gmra.mrb[28].mxu1 %vm2560_vm2, %v2743_v30 }
 0x56c   :  { %v2782_v46 = vpop.f32.mrb[16].mxu1 }
 0x56d   :  { %v3973_v42 = vpop.f32.mrb[17].mxu1 }
 0x56e   :  { %v2785_v24 = vpop.f32.mrb[18].mxu1 }
 0x56f   :  { %v3974_v63 = vpop.f32.mrb[19].mxu1 }
 0x574   :  { %v2870_v20 = vpop.f32.mrb[20].mxu1 }
 0x575   :  { %v3097_v47 = vcombine.low %v2782_v46, %v2870_v20  ;;  %v3098_v43 = vcombine.high %v2782_v46, %v2870_v20  ;;  %v3985_v29 = vpop.f32.mrb[21].mxu1 }
 0x576   :  { %v2873_v51 = vpop.f32.mrb[22].mxu1 }
 0x577   :  { %v3165_v31 = vcombine.low %v2785_v24, %v2873_v51  ;;  %v3166_v23 = vcombine.high %v2785_v24, %v2873_v51  ;;  %v3986_v41 = vpop.f32.mrb[23].mxu1  ;;  %v3105_v52 = vrot.slane %v3097_v47, %v4573_v53  ;;  %v3112_v28 = vrot.slane %v3098_v43, %v4573_v53 }
 0x579   :  { %v3173_v10 = vrot.slane %v3165_v31, %v4573_v53  ;;  %v3180_v18 = vrot.slane %v3166_v23, %v4573_v53 }
 0x58e   :  { %v2826_v22 = vpop.f32.mrb[28].mxu0 }
 0x58f   :  { %v3979_v1 = vpop.f32.mrb[29].mxu0 }
 0x590   :  { %v2829_v34 = vpop.f32.mrb[30].mxu0 }
 0x591   :  { %v3980_v14 = vpop.f32.mrb[31].mxu0 }
 0x596   :  { %v2914_v36 = vpop.f32.mrb[32].mxu0 }
 0x597   :  { %v3113_v55 = vcombine.low %v2826_v22, %v2914_v36  ;;  %v3114_v27 = vcombine.high %v2826_v22, %v2914_v36  ;;  %v3991_v16 = vpop.f32.mrb[33].mxu0 }
 0x598   :  { %v2917_v44 = vpop.f32.mrb[34].mxu0 }
 0x599   :  { %v3121_v11 = vrot.slane %v3113_v55, %v4573_v53  ;;  %v3128_v12 = vrot.slane %v3114_v27, %v4573_v53  ;;  %v3181_v54 = vcombine.low %v2829_v34, %v2917_v44  ;;  %v3182_v0 = vcombine.high %v2829_v34, %v2917_v44  ;;  %v3992_v61 = vpop.f32.mrb[35].mxu0 }
 0x59a   :  { %v3706_v61 = vld [vmem:[#allocation8 + $0x8] sm:$0xff] }
 0x59b   :  { %v3129_v50 = vcombine.low %v3105_v52, %v3121_v11  ;;  %v3130_v9 = vcombine.high %v3105_v52, %v3121_v11  ;;  %v3145_v33 = vcombine.low %v3112_v28, %v3128_v12  ;;  %v3146_v19 = vcombine.high %v3112_v28, %v3128_v12 }
 0x59c   :  { %v3189_v60 = vrot.slane %v3181_v54, %v4573_v53  ;;  %v3196_v58 = vrot.slane %v3182_v0, %v4573_v53  ;;  %v3705_v0 = vld [vmem:[#allocation8] sm:$0xff] }
 0x59d   :  { %v3137_v3 = vrot.slane %v3129_v50, %v4578_v56  ;;  %v3144_v21 = vrot.slane %v3130_v9, %v4578_v56  ;;  %v3153_v35 = vrot.slane %v3145_v33, %v4578_v56  ;;  %v3160_v5 = vrot.slane %v3146_v19, %v4578_v56  ;;  %v3707_v50 = vld [vmem:[#allocation8 + $0x10] sm:$0xff]  ;;  %v3708_v33 = vld [vmem:[#allocation8 + $0x18] sm:$0xff] }
 0x59e   :  { %v3197_v40 = vcombine.low %v3173_v10, %v3189_v60  ;;  %v3198_v4 = vcombine.high %v3173_v10, %v3189_v60  ;;  %v3213_v49 = vcombine.low %v3180_v18, %v3196_v58  ;;  %v3214_v26 = vcombine.high %v3180_v18, %v3196_v58  ;;  %v3709_v58 = vld [vmem:[#allocation8 + $0x20] sm:$0xff] }
 0x59f   :  { %v3369_v6 = vcombine.low %v3137_v3, %v3144_v21  ;;  %v3841_v7 = vcombine.high %v3137_v3, %v3144_v21  ;;  %v3385_v48 = vcombine.low %v3153_v35, %v3160_v5  ;;  %v3842_v25 = vcombine.high %v3153_v35, %v3160_v5  ;;  %v3710_v3 = vld [vmem:[#allocation8 + $0x28] sm:$0xff]  ;;  %v3711_v35 = vld [vmem:[#allocation8 + $0x30] sm:$0xff]  ;;  %v3712_v5 = vld [vmem:[#allocation8 + $0x38] sm:$0xff] }
 0x5a0   :  { %v3205_v39 = vrot.slane %v3197_v40, %v4578_v56  ;;  %v3212_v13 = vrot.slane %v3198_v4, %v4578_v56  ;;  %v3221_v45 = vrot.slane %v3213_v49, %v4578_v56  ;;  %v3228_v8 = vrot.slane %v3214_v26, %v4578_v56  ;;  %v3713_v4 = vld [vmem:[#allocation8 + $0x40] sm:$0xff]  ;;  %v3714_v49 = vld [vmem:[#allocation8 + $0x48] sm:$0xff] }
 0x5a1   :  { %v3376_v57 = vrot.slane %v3369_v6, %v4573_v53  ;;  %v3384_v17 = vrot.slane %v3841_v7, %v4573_v53  ;;  %v3392_v32 = vrot.slane %v3385_v48, %v4573_v53  ;;  %v3400_v62 = vrot.slane %v3842_v25, %v4573_v53 }
 0x5a2   :  { %v3437_v37 = vcombine.low %v3205_v39, %v3212_v13  ;;  %v3843_v2 = vcombine.high %v3205_v39, %v3212_v13  ;;  %v3453_v15 = vcombine.low %v3221_v45, %v3228_v8  ;;  %v3844_v38 = vcombine.high %v3221_v45, %v3228_v8 }
 0x5a3   :  { %v3402_v59 = vcombine.high %v3376_v57, %v3384_v17  ;;  %v3418_v30 = vcombine.high %v3392_v32, %v3400_v62  ;;  %v3401_v46 = vcombine.low %v3376_v57, %v3384_v17  ;;  %v3417_v42 = vcombine.low %v3392_v32, %v3400_v62 }
 0x5a4   :  { %v3444_v24 = vrot.slane %v3437_v37, %v4573_v53  ;;  %v3452_v63 = vrot.slane %v3843_v2, %v4573_v53  ;;  %v3460_v20 = vrot.slane %v3453_v15, %v4573_v53  ;;  %v3468_v47 = vrot.slane %v3844_v38, %v4573_v53 }
 0x5a5   :  { %v3416_v43 = vrot.slane %v3402_v59, %v4578_v56  ;;  %v3432_v29 = vrot.slane %v3418_v30, %v4578_v56  ;;  %v5338_v51 = vrot.slane %v3401_v46, %v4578_v56  ;;  %v5341_v31 = vrot.slane %v3417_v42, %v4578_v56 }
 0x5a6   :  { %v3470_v23 = vcombine.high %v3444_v24, %v3452_v63  ;;  %v3486_v41 = vcombine.high %v3460_v20, %v3468_v47  ;;  %v3469_v22 = vcombine.low %v3444_v24, %v3452_v63  ;;  %v3485_v1 = vcombine.low %v3460_v20, %v3468_v47 }
 0x5a7   :  { %v3435_v34 = vcombine.low %v3416_v43, %v3432_v29  ;;  %v3433_v14 = vcombine.low %v5338_v51, %v5341_v31  ;;  %v3434_v36 = vcombine.high %v5338_v51, %v5341_v31  ;;  %v3436_v55 = vcombine.high %v3416_v43, %v3432_v29 }
 0x5a8   :  { %v3484_v27 = vrot.slane %v3470_v23, %v4578_v56  ;;  %v3500_v16 = vrot.slane %v3486_v41, %v4578_v56  ;;  %v5350_v52 = vrot.slane %v3469_v22, %v4578_v56  ;;  %v5353_v28 = vrot.slane %v3485_v1, %v4578_v56 }
 0x5a9   :  { %v3721_v9 = vpack.c.bf16 %v3706_v61, %v3705_v0  ;;  %v3722_v60 = vpack.c.bf16 %v3708_v33, %v3707_v50  ;;  %v3723_v21 = vpack.c.bf16 %v3710_v3, %v3709_v58  ;;  %v3724_v40 = vpack.c.bf16 %v3712_v5, %v3711_v35 }
 0x5aa   :  { %v3503_v44 = vcombine.low %v3484_v27, %v3500_v16  ;;  %v3502_v11 = vcombine.high %v5350_v52, %v5353_v28  ;;  %v3501_v12 = vcombine.low %v5350_v52, %v5353_v28  ;;  %v3504_v54 = vcombine.high %v3484_v27, %v3500_v16 }
 0x5ab   :  { %4017 = vmatprep.subr.bf16.mxu1 %v3721_v9  ;;  %v3725_v26 = vpack.c.bf16 %v3714_v49, %v3713_v4 }
 0x5ac   :  { %v4059_v19 = vpack.i.bf16 %v3503_v44, %v3435_v34  ;;  %v4054_v10 = vpack.i.bf16 %v3502_v11, %v3434_v36  ;;  %v4074_v18 = vpack.i.bf16 %v3504_v54, %v3436_v55  ;;  %4018 = vmatpush3.bf16.msra.mxu1 %v3721_v9 }
 0x5ad   :  { %4019 = vmatprep.subr.bf16.mxu1 %v3722_v60 }
 0x5ae   :  { %4060 = vrot.lane.b32.xlu1 %v4059_v19, %s4291_s2  ;;  %4055 = vrot.lane.b32.xlu0 %v4054_v10, %s4293_s20 }
 0x5b0   :  { %4020 = vmatpush3.bf16.msra.mxu1 %v3722_v60 }
 0x5b1   :  { %4021 = vmatprep.subr.bf16.mxu1 %v3723_v21 }
 0x5b2   :  { %4075 = vrot.lane.b32.xlu0 %v4074_v18, %s4292_s19 }
 0x5b4   :  { %4022 = vmatpush3.bf16.msra.mxu1 %v3723_v21 }
 0x5b5   :  { %4023 = vmatprep.subr.bf16.mxu1 %v3724_v40 }
 0x5b8   :  { %4024 = vmatpush3.bf16.msra.mxu1 %v3724_v40 }
 0x5b9   :  { %4025 = vmatprep.subr.bf16.mxu1 %v3725_v26 }
 0x5bc   :  { %4026 = vmatpush3.bf16.msra.mxu1 %v3725_v26 }
 0x5dd   :  { %v2958_v6 = vpop.f32.mrb[24].mxu1  ;;  %v3002_v7 = vpop.f32.mrb[36].mxu0 }
 0x5de   :  { %v3997_v48 = vpop.f32.mrb[25].mxu1  ;;  %v4003_v25 = vpop.f32.mrb[37].mxu0 }
 0x5df   :  { %v2961_v39 = vpop.f32.mrb[26].mxu1  ;;  %v3005_v13 = vpop.f32.mrb[38].mxu0 }
 0x5e0   :  { %v3998_v45 = vpop.f32.mrb[27].mxu1  ;;  %v4004_v8 = vpop.f32.mrb[39].mxu0 }
 0x5e5   :  { %v3090_v57 = vpop.f32.mrb[40].mxu0 }
 0x5e6   :  { %v3249_v17 = vcombine.low %v3002_v7, %v3090_v57  ;;  %v3250_v32 = vcombine.high %v3002_v7, %v3090_v57  ;;  %v4015_v62 = vpop.f32.mrb[41].mxu0 }
 0x5e7   :  { %v3093_v37 = vpop.f32.mrb[42].mxu0 }
 0x5e8   :  { %v3317_v2 = vcombine.low %v3005_v13, %v3093_v37  ;;  %v3318_v15 = vcombine.high %v3005_v13, %v3093_v37  ;;  %v4016_v38 = vpop.f32.mrb[43].mxu0  ;;  %v3257_v24 = vrot.slane %v3249_v17, %v4573_v53  ;;  %v3264_v63 = vrot.slane %v3250_v32, %v4573_v53 }
 0x5ea   :  { %v3325_v55 = vrot.slane %v3317_v2, %v4573_v53  ;;  %v3332_v27 = vrot.slane %v3318_v15, %v4573_v53 }
 0x606   :  { %v3046_v59 = vpop.f32.mrb[28].mxu1 }
 0x607   :  { %v3233_v30 = vcombine.low %v2958_v6, %v3046_v59  ;;  %v3234_v46 = vcombine.high %v2958_v6, %v3046_v59  ;;  %v4009_v42 = vpop.f32.mrb[29].mxu1 }
 0x608   :  { %v3049_v20 = vpop.f32.mrb[30].mxu1 }
 0x609   :  { %v3241_v47 = vrot.slane %v3233_v30, %v4573_v53  ;;  %v3248_v43 = vrot.slane %v3234_v46, %v4573_v53  ;;  %v3301_v29 = vcombine.low %v2961_v39, %v3049_v20  ;;  %v3302_v23 = vcombine.high %v2961_v39, %v3049_v20  ;;  %v4010_v41 = vpop.f32.mrb[31].mxu1 }
 0x60b   :  { %v3265_v22 = vcombine.low %v3241_v47, %v3257_v24  ;;  %v3266_v1 = vcombine.high %v3241_v47, %v3257_v24  ;;  %v3281_v34 = vcombine.low %v3248_v43, %v3264_v63  ;;  %v3282_v36 = vcombine.high %v3248_v43, %v3264_v63  ;;  %v3715_v24 = vld [vmem:[#allocation8 + $0x50] sm:$0xff]  ;;  %v3716_v63 = vld [vmem:[#allocation8 + $0x58] sm:$0xff] }
 0x60c   :  { %v3309_v16 = vrot.slane %v3301_v29, %v4573_v53  ;;  %v3316_v44 = vrot.slane %v3302_v23, %v4573_v53  ;;  %v3717_v29 = vld [vmem:[#allocation8 + $0x60] sm:$0xff]  ;;  %v3718_v23 = vld [vmem:[#allocation8 + $0x68] sm:$0xff] }
 0x60d   :  { %v3273_v11 = vrot.slane %v3265_v22, %v4578_v56  ;;  %v3280_v54 = vrot.slane %v3266_v1, %v4578_v56  ;;  %v3289_v0 = vrot.slane %v3281_v34, %v4578_v56  ;;  %v3296_v61 = vrot.slane %v3282_v36, %v4578_v56 }
 0x60e   :  { %v3333_v50 = vcombine.low %v3309_v16, %v3325_v55  ;;  %v3334_v9 = vcombine.high %v3309_v16, %v3325_v55  ;;  %v3349_v33 = vcombine.low %v3316_v44, %v3332_v27  ;;  %v3350_v19 = vcombine.high %v3316_v44, %v3332_v27 }
 0x60f   :  { %v3505_v10 = vcombine.low %v3273_v11, %v3280_v54  ;;  %v3845_v18 = vcombine.high %v3273_v11, %v3280_v54  ;;  %v3521_v60 = vcombine.low %v3289_v0, %v3296_v61  ;;  %v3846_v58 = vcombine.high %v3289_v0, %v3296_v61 }
 0x610   :  { %v3341_v3 = vrot.slane %v3333_v50, %v4578_v56  ;;  %v3348_v21 = vrot.slane %v3334_v9, %v4578_v56  ;;  %v3357_v35 = vrot.slane %v3349_v33, %v4578_v56  ;;  %v3364_v5 = vrot.slane %v3350_v19, %v4578_v56  ;;  %v3719_v50 = vld [vmem:[#allocation8 + $0x70] sm:$0xff]  ;;  %v3720_v9 = vld [vmem:[#allocation8 + $0x78] sm:$0xff] }
 0x611   :  { %v3512_v40 = vrot.slane %v3505_v10, %v4573_v53  ;;  %v3520_v4 = vrot.slane %v3845_v18, %v4573_v53  ;;  %v3528_v49 = vrot.slane %v3521_v60, %v4573_v53  ;;  %v3536_v26 = vrot.slane %v3846_v58, %v4573_v53 }
 0x612   :  { %v3573_v6 = vcombine.low %v3341_v3, %v3348_v21  ;;  %v3847_v7 = vcombine.high %v3341_v3, %v3348_v21  ;;  %v3589_v48 = vcombine.low %v3357_v35, %v3364_v5  ;;  %v3848_v25 = vcombine.high %v3357_v35, %v3364_v5 }
 0x613   :  { %v3537_v39 = vcombine.low %v3512_v40, %v3520_v4  ;;  %v3553_v13 = vcombine.low %v3528_v49, %v3536_v26  ;;  %v3538_v45 = vcombine.high %v3512_v40, %v3520_v4  ;;  %v3554_v8 = vcombine.high %v3528_v49, %v3536_v26 }
 0x614   :  { %v3580_v57 = vrot.slane %v3573_v6, %v4573_v53  ;;  %v3588_v17 = vrot.slane %v3847_v7, %v4573_v53  ;;  %v3596_v32 = vrot.slane %v3589_v48, %v4573_v53  ;;  %v3604_v62 = vrot.slane %v3848_v25, %v4573_v53 }
 0x615   :  { %v5387_v37 = vrot.slane %v3537_v39, %v4578_v56  ;;  %v5390_v2 = vrot.slane %v3553_v13, %v4578_v56  ;;  %v3552_v15 = vrot.slane %v3538_v45, %v4578_v56  ;;  %v3568_v38 = vrot.slane %v3554_v8, %v4578_v56 }
 0x616   :  { %v3605_v59 = vcombine.low %v3580_v57, %v3588_v17  ;;  %v3621_v30 = vcombine.low %v3596_v32, %v3604_v62  ;;  %v3606_v46 = vcombine.high %v3580_v57, %v3588_v17  ;;  %v3622_v42 = vcombine.high %v3596_v32, %v3604_v62 }
 0x617   :  { %v3569_v20 = vcombine.low %v5387_v37, %v5390_v2  ;;  %v3570_v53 = vcombine.high %v5387_v37, %v5390_v2  ;;  %v3571_v47 = vcombine.low %v3552_v15, %v3568_v38  ;;  %v3572_v43 = vcombine.high %v3552_v15, %v3568_v38 }
 0x618   :  { %v3613_v41 = vrot.slane %v3605_v59, %v4578_v56  ;;  %v3629_v22 = vrot.slane %v3621_v30, %v4578_v56  ;;  %v3620_v1 = vrot.slane %v3606_v46, %v4578_v56  ;;  %v3636_v34 = vrot.slane %v3622_v42, %v4578_v56 }
 0x619   :  { %v3726_v36 = vpack.c.bf16 %v3716_v63, %v3715_v24  ;;  %v3727_v55 = vpack.c.bf16 %v3718_v23, %v3717_v29  ;;  %v3728_v33 = vpack.c.bf16 %v3720_v9, %v3719_v50 }
 0x61a   :  { %v3638_v27 = vcombine.high %v3613_v41, %v3629_v22  ;;  %v3637_v16 = vcombine.low %v3613_v41, %v3629_v22  ;;  %v3639_v44 = vcombine.low %v3620_v1, %v3636_v34  ;;  %v3640_v11 = vcombine.high %v3620_v1, %v3636_v34 }
 0x61b   :  { %4027 = vmatprep.subr.bf16.mxu1 %v3726_v36 }
 0x61c   :  { %v4064_v54 = vpack.i.bf16 %v3638_v27, %v3570_v53  ;;  %v4069_v0 = vpack.i.bf16 %v3639_v44, %v3571_v47  ;;  %v4079_v61 = vpack.i.bf16 %v3640_v11, %v3572_v43  ;;  %4028 = vmatpush3.bf16.msra.mxu1 %v3726_v36 }
 0x61d   :  { %4029 = vmatprep.subr.bf16.mxu1 %v3727_v55 }
 0x61e   :  { %4065 = vrot.lane.b32.xlu1 %v4064_v54, %s4293_s20 }
 0x620   :  { %v4061_v19 = vpop.permute.xlu1 %4060  ;;  %v4056_v10 = vpop.permute.xlu0 %4055  ;;  %4030 = vmatpush3.bf16.msra.mxu1 %v3727_v55 }
 0x621   :  { %v4058_v56 = vunpack.i.h.bf16 %v4056_v10  ;;  %v4057_v18 = vunpack.i.l.bf16 %v4056_v10  ;;  %4031 = vmatprep.subr.bf16.mxu1 %v3728_v33  ;;  %v4063_v60 = vunpack.i.h.bf16 %v4061_v19  ;;  %v4062_v58 = vunpack.i.l.bf16 %v4061_v19 }
 0x622   :  { %4070 = vrot.lane.b32.xlu1 %v4069_v0, %s4291_s2 }
 0x623   :  { %v3690_v3 = vsel %vm2183_vm1, %v3501_v12, %v4058_v56  ;;  %v3689_v21 = vsel %vm2183_vm1, %v3433_v14, %v4057_v18 }
 0x624   :  { %v4076_v35 = vpop.permute.xlu0 %4075  ;;  %4032 = vmatpush3.bf16.msra.mxu1 %v3728_v33  ;;  %v3694_v4 = vsel %vm3693_vm3, %v3689_v21, %v4062_v58  ;;  %v3695_v49 = vsel %vm3693_vm3, %v3690_v3, %v4063_v60 }
 0x625   :  { %v4078_v5 = vunpack.i.h.bf16 %v4076_v35  ;;  %v4077_v40 = vunpack.i.l.bf16 %v4076_v35 }
 0x626   :  { %4080 = vrot.lane.b32.xlu1 %v4079_v61, %s4292_s19 }
 0x627   :  { %v3699_v52 = vsel %vm3698_vm4, %v3694_v4, %v4077_v40  ;;  %v3700_v28 = vsel %vm3698_vm4, %v3695_v49, %v4078_v5 }
 0x628   :  { %v3703_v12 = vpack.c.bf16 %v3700_v28, %v3699_v52 }
 0x62a   :  { %4033 = vmatprep.mubr.bf16.mxu1 %v3703_v12 }
 0x690   :  { %v4066_v51 = vpop.permute.xlu1 %4065 }
 0x691   :  { %v4068_v14 = vunpack.i.h.bf16 %v4066_v51  ;;  %v4067_v26 = vunpack.i.l.bf16 %v4066_v51 }
 0x693   :  { %v3691_v25 = vsel %vm2183_vm1, %v3569_v20, %v4067_v26  ;;  %v3692_v39 = vsel %vm2183_vm1, %v3637_v16, %v4068_v14 }
 0x694   :  { %v4071_v31 = vpop.permute.xlu1 %4070 }
 0x695   :  { %v4073_v6 = vunpack.i.h.bf16 %v4071_v31  ;;  %v4072_v7 = vunpack.i.l.bf16 %v4071_v31 }
 0x697   :  { %v3696_v8 = vsel %vm3693_vm3, %v3691_v25, %v4072_v7  ;;  %v3697_v57 = vsel %vm3693_vm3, %v3692_v39, %v4073_v6 }
 0x698   :  { %v4081_v48 = vpop.permute.xlu1 %4080 }
 0x699   :  { %v4083_v13 = vunpack.i.h.bf16 %v4081_v48  ;;  %v4082_v45 = vunpack.i.l.bf16 %v4081_v48 }
 0x69b   :  { %v3701_v17 = vsel %vm3698_vm4, %v3696_v8, %v4082_v45  ;;  %v3702_v32 = vsel %vm3698_vm4, %v3697_v57, %v4083_v13 }
 0x69c   :  { %v3704_v62 = vpack.c.bf16 %v3702_v32, %v3701_v17 }
 0x69e   :  { %4034 = vmatmul.mubr.bf16.vlgmr.msra.gmra.mrb[32].mxu1 %v3704_v62 }
 0x771   :  { %v4035_v37 = vpop.f32.mrb[32].mxu1 }
 0x772   :  { %3780 = vst [vmem:[#allocation10 + $0x10] sm:$0xff] %v4035_v37  ;;  %v3763_v2 = vpop.f32.mrb[33].mxu1 }
 0x773   :  { %3778 = vst [vmem:[#allocation10] sm:$0xff] %v3763_v2  ;;  %v4036_v15 = vpop.f32.mrb[34].mxu1 }
 0x774   :  { %3781 = vst [vmem:[#allocation10 + $0x18] sm:$0xff] %v4036_v15  ;;  %v3766_v38 = vpop.f32.mrb[35].mxu1 }
 0x775   :  { %3779 = vst [vmem:[#allocation10 + $0x8] sm:$0xff] %v3766_v38 }
 0x776   :  { %4263 = shalt.err (!%p4260_p8)
}
 0x777   :  { %s4264_s27 = scalar_lea.hbm %s5443_s5, 512 }
 0x778   :  { %p4265_p9 = scmp.ne.s32.totalorder %s5443_s5, %s4264_s27  ;;  %p4268_p10 = scmp.lt.u32.totalorder %s4264_s27, %s5443_s5 }
 0x77a   :  { %p4270_p11 = pnand %p4268_p10, %p4265_p9 }
 0x77c   :  { %4273 = shalt.err (!%p4270_p11)
}
 0x77d   :  { %3793 = dma.vmem_to_hbm [thread:$0]  %s3788_s23, 512, %s5443_s5, [#allocation4], %s4284_s30, %s4284_s30, %s4285_s6  }
 0x77e   :  { %4280 = dma.done.wait [#allocation4], 512  }
 0x77f   :  { %4281 = vsyncadd [#allocation4], 4294966784 }
 0x780   :  { %3797 = vsyncpa [#allocation3], 1 }
 0x781   :  { %3798 = vsyncpa [#allocation6], 1 }
 0x782   :  { %3799 = vsyncpa [#allocation9], 1 }
 0x783   :  { %3800 = vsyncpa [#allocation4], 1 }

</bundles_post_ra>
